<compile_context>
chip_gen: v5e
topology: v5e:2x2
jax: 0.10.0
libtpu: 0.0.40
codegen_flags: <defaults>
</compile_context>

<pallas_src>
import math

import jax
import jax.numpy as jnp
import numpy as np
from jax.experimental import pallas as pl
from jax.experimental.pallas import tpu as pltpu

_BN_EPS = 1e-5


# ----------------------------------------------------------------------------
# Static spatial-resampling matrices (numpy, built at trace time).
# ----------------------------------------------------------------------------
def _reflect_pad_matrix(n: int, pad: int) -> np.ndarray:
    """M (n, n+2p) with M[src, j] = 1 so that (x @ M)[j] = reflect_pad(x)[j]."""
    src = list(range(pad, 0, -1)) + list(range(n)) + list(range(n - 2, n - 2 - pad, -1))
    m = np.zeros((n, n + 2 * pad), dtype=np.float32)
    for j, s in enumerate(src):
        m[s, j] = 1.0
    return m


def _stride2_pad1_matrix(n: int) -> np.ndarray:
    """M (n, n_out) s.t. (x @ M)[k] = x[2k-1], zero where 2k-1 hits the zero pad."""
    n_out = (n + 1) // 2 + 1          # PyTorch conv out size for k=1, stride=2, pad=1
    m = np.zeros((n, n_out), dtype=np.float32)
    for k in range(n_out):
        s = 2 * k - 1
        if 0 <= s < n:
            m[s, k] = 1.0
    return m


def _spatial_matrices(h: int, w: int):
    """Per-stage (left, right) resampling matrices and the final spatial size."""
    def nxt(n):
        return (n + 1) // 2 + 1

    h1, w1 = nxt(h + 6), nxt(w + 6)   # after reflect-pad(3) then stride-2/pad-1 conv
    h2, w2 = nxt(h1), nxt(w1)
    h3, w3 = nxt(h2), nxt(w2)

    a_h = _reflect_pad_matrix(h, 3) @ _stride2_pad1_matrix(h + 6)   # (h, h1)
    a_w = _reflect_pad_matrix(w, 3) @ _stride2_pad1_matrix(w + 6)   # (w, w1)
    mats = (
        (a_h.T.copy(), a_w),                                        # (h1,h), (w,w1)
        (_stride2_pad1_matrix(h1).T.copy(), _stride2_pad1_matrix(w1)),  # (h2,h1), (w1,w2)
        (_stride2_pad1_matrix(h2).T.copy(), _stride2_pad1_matrix(w2)),  # (h3,h2), (w2,w3)
    )
    return mats, (h3, w3)


# ----------------------------------------------------------------------------
# Kernel (one batch sample per grid step).
# ----------------------------------------------------------------------------
def _mix_channels(planes, wb_ref):
    """1x1 conv + folded BN + ReLU: out[o] = relu(sum_c wb[o,c]*planes[c] + wb[o,-1])."""
    c_out, c_in_p1 = wb_ref.shape
    c_in = c_in_p1 - 1
    outs = []
    for o in range(c_out):
        acc = planes[0] * wb_ref[o, 0]
        for c in range(1, c_in):
            acc = acc + planes[c] * wb_ref[o, c]
        outs.append(jnp.maximum(acc + wb_ref[o, c_in], 0.0))
    return outs


def _resample(planes, l_ref, r_ref):
    """Spatial (pad + stride-2 sample) as two small matmuls per plane (MXU)."""
    l = l_ref[...]
    r = r_ref[...]
    return [
        jnp.dot(l, jnp.dot(p, r, preferred_element_type=jnp.float32),
                preferred_element_type=jnp.float32)
        for p in planes
    ]


def _reuse_relu_kernel(x_ref, wb0_ref, wb1_ref, wb2_ref, wb3_ref,
                       l1_ref, r1_ref, l2_ref, r2_ref, l3_ref, r3_ref, out_ref):
    c_in = x_ref.shape[1]
    x_planes = [x_ref[0, c] for c in range(c_in)]     # (H, W) planes, W on lanes

    h0 = _mix_channels(x_planes, wb0_ref)             # conv0(4->1) + BN + ReLU (pointwise)
    s1 = _resample(h0, l1_ref, r1_ref)                # reflect-pad(3) ∘ stride-2/pad-1
    h1 = _mix_channels(s1, wb1_ref)                   # conv1(1->2) + BN + ReLU
    s2 = _resample(h1, l2_ref, r2_ref)                # stride-2/pad-1
    h2 = _mix_channels(s2, wb2_ref)                   # conv2(2->4) + BN + ReLU
    s3 = _resample(h2, l3_ref, r3_ref)                # stride-2/pad-1
    h3 = _mix_channels(s3, wb3_ref)                   # conv3(4->8) + BN + ReLU

    for o, plane in enumerate(h3):
        out_ref[0, o] = plane


# ----------------------------------------------------------------------------
# Wrapper
# ----------------------------------------------------------------------------
def _fold_bn(w, b, bn):
    """Fold inference-mode BatchNorm into the 1x1 conv -> (c_out, c_in + 1) table."""
    # TODO(synk): BatchNorm2d folded in inference mode (running stats); training-mode
    # batch statistics are not computed in-kernel.
    scale = bn["gamma"] / jnp.sqrt(bn["var"] + _BN_EPS)
    shift = bn["beta"] - bn["mean"] * scale
    w_eff = w * scale[:, None]
    b_eff = b * scale + shift
    return jnp.concatenate([w_eff, b_eff[:, None]], axis=1).astype(jnp.float32)


def reuse_relu_forward(params, x):
    b, c_in, h, w = x.shape
    wb = [_fold_bn(params[f"w{i}"], params[f"b{i}"], params[f"bn{i}"]) for i in range(4)]
    mats, (h_out, w_out) = _spatial_matrices(h, w)
    (l1, r1), (l2, r2), (l3, r3) = [tuple(jnp.asarray(m) for m in pair) for pair in mats]
    c_out = wb[3].shape[0]

    def smem_spec():
        # Tiny (c_out, c_in+1) weight/bias tables -> SMEM scalars for the VPU mixes.
        return pl.BlockSpec(memory_space=pltpu.MemorySpace.SMEM)

    def full_spec(shape):
        # Whole-array VMEM block, constant index_map -> fetched once, reused every step.
        return pl.BlockSpec(shape, lambda bi, _r=len(shape): (0,) * _r)

    return pl.pallas_call(
        _reuse_relu_kernel,
        grid=(b,),
        in_specs=[
            pl.BlockSpec((1, c_in, h, w), lambda bi: (bi, 0, 0, 0)),
            smem_spec(), smem_spec(), smem_spec(), smem_spec(),
            full_spec(l1.shape), full_spec(r1.shape),
            full_spec(l2.shape), full_spec(r2.shape),
            full_spec(l3.shape), full_spec(r3.shape),
        ],
        out_specs=pl.BlockSpec((1, c_out, h_out, w_out), lambda bi: (bi, 0, 0, 0)),
        out_shape=jax.ShapeDtypeStruct((b, c_out, h_out, w_out), jnp.float32),
        compiler_params=pltpu.CompilerParams(dimension_semantics=("parallel",)),
    )(x, wb[0], wb[1], wb[2], wb[3], l1, r1, l2, r2, l3, r3)


# ----------------------------------------------------------------------------
# Deterministic params (PyTorch-style defaults) and pure-JAX reference.
# ----------------------------------------------------------------------------
def init_params(key):
    chans = [(4, 1), (1, 2), (2, 4), (4, 8)]
    ks = jax.random.split(key, 2 * len(chans))
    params = {}
    for i, (ci, co) in enumerate(chans):
        bound = 1.0 / math.sqrt(ci)          # fan_in = ci * 1 * 1
        params[f"w{i}"] = jax.random.uniform(ks[2 * i], (co, ci), jnp.float32, -bound, bound)
        params[f"b{i}"] = jax.random.uniform(ks[2 * i + 1], (co,), jnp.float32, -bound, bound)
        params[f"bn{i}"] = {
            "gamma": jnp.ones((co,), jnp.float32),
            "beta": jnp.zeros((co,), jnp.float32),
            "mean": jnp.zeros((co,), jnp.float32),
            "var": jnp.ones((co,), jnp.float32),
        }
    return params


def _reference_forward(params, x):
    """Pure-JAX (XLA) reference of the PyTorch forward, for a correctness check."""
    def bn(y, p):
        scale = p["gamma"] / jnp.sqrt(p["var"] + _BN_EPS)
        shift = p["beta"] - p["mean"] * scale
        return y * scale[None, :, None, None] + shift[None, :, None, None]

    def conv1x1(y, w, b, stride, pad):
        if pad:
            y = jnp.pad(y, ((0, 0), (0, 0), (pad, pad), (pad, pad)))
        y = y[:, :, ::stride, ::stride]
        return jnp.einsum("oc,bchw->bohw", w, y) + b[None, :, None, None]

    y = jnp.pad(x, ((0, 0), (0, 0), (3, 3), (3, 3)), mode="reflect")
    y = jnp.maximum(bn(conv1x1(y, params["w0"], params["b0"], 1, 0), params["bn0"]), 0.0)
    for i in range(1, 4):
        y = jnp.maximum(bn(conv1x1(y, params[f"w{i}"], params[f"b{i}"], 2, 1),
                           params[f"bn{i}"]), 0.0)
    return y


if __name__ == "__main__":
    key = jax.random.PRNGKey(0)
    pkey, xkey = jax.random.split(key)
    params = init_params(pkey)

    x = jax.random.normal(xkey, (2, 4, 16, 16), dtype=jnp.float32)   # (B, C, H, W)

    out = reuse_relu_forward(params, x)
    out = jax.block_until_ready(out)
    assert out.shape == (2, 8, 5, 5), out.shape

    ref = _reference_forward(params, x)
    max_err = float(jnp.max(jnp.abs(out - ref)))
    assert max_err < 1e-4, f"mismatch vs reference: {max_err}"

    print("KERNEL_OK")
</pallas_src>

<mosaic_0001>
module attributes {stable_mosaic.version = 11 : i64} {
  func.func @_reuse_relu_kernel(%arg0: i32, %arg1: memref<1x4x16x16xf32, #tpu.memory_space<vmem>>, %arg2: memref<1x5xf32, #tpu.memory_space<smem>>, %arg3: memref<2x2xf32, #tpu.memory_space<smem>>, %arg4: memref<4x3xf32, #tpu.memory_space<smem>>, %arg5: memref<8x5xf32, #tpu.memory_space<smem>>, %arg6: memref<12x16xf32, #tpu.memory_space<vmem>>, %arg7: memref<16x12xf32, #tpu.memory_space<vmem>>, %arg8: memref<7x12xf32, #tpu.memory_space<vmem>>, %arg9: memref<12x7xf32, #tpu.memory_space<vmem>>, %arg10: memref<5x7xf32, #tpu.memory_space<vmem>>, %arg11: memref<7x5xf32, #tpu.memory_space<vmem>>, %arg12: memref<1x8x5x5xf32, #tpu.memory_space<vmem>>) attributes {dimension_semantics = [#tpu.dimension_semantics<parallel>], iteration_bounds = array<i64: 2>, scalar_prefetch = 0 : i64, scratch_operands = 0 : i64, tpu.core_type = #tpu.core_type<tc>, window_params = [{transform_indices = @transform_0, window_bounds = array<i64: 1, 4, 16, 16>}, {transform_indices = @transform_1, window_bounds = array<i64: 1, 5>}, {transform_indices = @transform_2, window_bounds = array<i64: 2, 2>}, {transform_indices = @transform_3, window_bounds = array<i64: 4, 3>}, {transform_indices = @transform_4, window_bounds = array<i64: 8, 5>}, {pipeline_mode = #tpu.pipeline_mode<synchronous>, transform_indices = @transform_5, window_bounds = array<i64: 12, 16>}, {pipeline_mode = #tpu.pipeline_mode<synchronous>, transform_indices = @transform_6, window_bounds = array<i64: 16, 12>}, {pipeline_mode = #tpu.pipeline_mode<synchronous>, transform_indices = @transform_7, window_bounds = array<i64: 7, 12>}, {pipeline_mode = #tpu.pipeline_mode<synchronous>, transform_indices = @transform_8, window_bounds = array<i64: 12, 7>}, {pipeline_mode = #tpu.pipeline_mode<synchronous>, transform_indices = @transform_9, window_bounds = array<i64: 5, 7>}, {pipeline_mode = #tpu.pipeline_mode<synchronous>, transform_indices = @transform_10, window_bounds = array<i64: 7, 5>}, {transform_indices = @transform_11, window_bounds = array<i64: 1, 8, 5, 5>}]} {
    %c0 = arith.constant 0 : index
    %c0_0 = arith.constant 0 : index
    %c0_1 = arith.constant 0 : index
    %c0_2 = arith.constant 0 : index
    %0 = vector.load %arg1[%c0, %c0_0, %c0_1, %c0_2] : memref<1x4x16x16xf32, #tpu.memory_space<vmem>>, vector<1x1x16x16xf32>
    %1 = vector.shape_cast %0 : vector<1x1x16x16xf32> to vector<16x16xf32>
    %c0_3 = arith.constant 0 : index
    %c1 = arith.constant 1 : index
    %c0_4 = arith.constant 0 : index
    %c0_5 = arith.constant 0 : index
    %2 = vector.load %arg1[%c0_3, %c1, %c0_4, %c0_5] : memref<1x4x16x16xf32, #tpu.memory_space<vmem>>, vector<1x1x16x16xf32>
    %3 = vector.shape_cast %2 : vector<1x1x16x16xf32> to vector<16x16xf32>
    %c0_6 = arith.constant 0 : index
    %c2 = arith.constant 2 : index
    %c0_7 = arith.constant 0 : index
    %c0_8 = arith.constant 0 : index
    %4 = vector.load %arg1[%c0_6, %c2, %c0_7, %c0_8] : memref<1x4x16x16xf32, #tpu.memory_space<vmem>>, vector<1x1x16x16xf32>
    %5 = vector.shape_cast %4 : vector<1x1x16x16xf32> to vector<16x16xf32>
    %c0_9 = arith.constant 0 : index
    %c3 = arith.constant 3 : index
    %c0_10 = arith.constant 0 : index
    %c0_11 = arith.constant 0 : index
    %6 = vector.load %arg1[%c0_9, %c3, %c0_10, %c0_11] : memref<1x4x16x16xf32, #tpu.memory_space<vmem>>, vector<1x1x16x16xf32>
    %7 = vector.shape_cast %6 : vector<1x1x16x16xf32> to vector<16x16xf32>
    %c0_12 = arith.constant 0 : index
    %c0_13 = arith.constant 0 : index
    %8 = memref.load %arg2[%c0_12, %c0_13] : memref<1x5xf32, #tpu.memory_space<smem>>
    %9 = vector.broadcast %8 : f32 to vector<16x16xf32>
    %10 = arith.mulf %1, %9 : vector<16x16xf32>
    %c0_14 = arith.constant 0 : index
    %c1_15 = arith.constant 1 : index
    %11 = memref.load %arg2[%c0_14, %c1_15] : memref<1x5xf32, #tpu.memory_space<smem>>
    %12 = vector.broadcast %11 : f32 to vector<16x16xf32>
    %13 = arith.mulf %3, %12 : vector<16x16xf32>
    %14 = arith.addf %10, %13 : vector<16x16xf32>
    %c0_16 = arith.constant 0 : index
    %c2_17 = arith.constant 2 : index
    %15 = memref.load %arg2[%c0_16, %c2_17] : memref<1x5xf32, #tpu.memory_space<smem>>
    %16 = vector.broadcast %15 : f32 to vector<16x16xf32>
    %17 = arith.mulf %5, %16 : vector<16x16xf32>
    %18 = arith.addf %14, %17 : vector<16x16xf32>
    %c0_18 = arith.constant 0 : index
    %c3_19 = arith.constant 3 : index
    %19 = memref.load %arg2[%c0_18, %c3_19] : memref<1x5xf32, #tpu.memory_space<smem>>
    %20 = vector.broadcast %19 : f32 to vector<16x16xf32>
    %21 = arith.mulf %7, %20 : vector<16x16xf32>
    %22 = arith.addf %18, %21 : vector<16x16xf32>
    %c0_20 = arith.constant 0 : index
    %c4 = arith.constant 4 : index
    %23 = memref.load %arg2[%c0_20, %c4] : memref<1x5xf32, #tpu.memory_space<smem>>
    %24 = vector.broadcast %23 : f32 to vector<16x16xf32>
    %25 = arith.addf %22, %24 : vector<16x16xf32>
    %cst = arith.constant 0.000000e+00 : f32
    %26 = vector.broadcast %cst : f32 to vector<16x16xf32>
    %27 = arith.maximumf %25, %26 : vector<16x16xf32>
    %c0_21 = arith.constant 0 : index
    %c0_22 = arith.constant 0 : index
    %28 = vector.load %arg6[%c0_21, %c0_22] : memref<12x16xf32, #tpu.memory_space<vmem>>, vector<12x16xf32>
    %c0_23 = arith.constant 0 : index
    %c0_24 = arith.constant 0 : index
    %29 = vector.load %arg7[%c0_23, %c0_24] : memref<16x12xf32, #tpu.memory_space<vmem>>, vector<16x12xf32>
    %cst_25 = arith.constant dense<0.000000e+00> : vector<16x12xf32>
    %30 = tpu.matmul %27, %29, %cst_25 {dimension_numbers = #tpu.dot_dimension_numbers<[1], [0], [0], [1], [0, 0, 1, 1], [], []>} : vector<16x16xf32>, vector<16x12xf32>, vector<16x12xf32> -> vector<16x12xf32>
    %cst_26 = arith.constant dense<0.000000e+00> : vector<12x12xf32>
    %31 = tpu.matmul %28, %30, %cst_26 {dimension_numbers = #tpu.dot_dimension_numbers<[1], [0], [0], [1], [0, 0, 1, 1], [], []>} : vector<12x16xf32>, vector<16x12xf32>, vector<12x12xf32> -> vector<12x12xf32>
    %c0_27 = arith.constant 0 : index
    %c0_28 = arith.constant 0 : index
    %32 = memref.load %arg3[%c0_27, %c0_28] : memref<2x2xf32, #tpu.memory_space<smem>>
    %33 = vector.broadcast %32 : f32 to vector<12x12xf32>
    %34 = arith.mulf %31, %33 : vector<12x12xf32>
    %c0_29 = arith.constant 0 : index
    %c1_30 = arith.constant 1 : index
    %35 = memref.load %arg3[%c0_29, %c1_30] : memref<2x2xf32, #tpu.memory_space<smem>>
    %36 = vector.broadcast %35 : f32 to vector<12x12xf32>
    %37 = arith.addf %34, %36 : vector<12x12xf32>
    %cst_31 = arith.constant 0.000000e+00 : f32
    %38 = vector.broadcast %cst_31 : f32 to vector<12x12xf32>
    %39 = arith.maximumf %37, %38 : vector<12x12xf32>
    %c1_32 = arith.constant 1 : index
    %c0_33 = arith.constant 0 : index
    %40 = memref.load %arg3[%c1_32, %c0_33] : memref<2x2xf32, #tpu.memory_space<smem>>
    %41 = vector.broadcast %40 : f32 to vector<12x12xf32>
    %42 = arith.mulf %31, %41 : vector<12x12xf32>
    %c1_34 = arith.constant 1 : index
    %c1_35 = arith.constant 1 : index
    %43 = memref.load %arg3[%c1_34, %c1_35] : memref<2x2xf32, #tpu.memory_space<smem>>
    %44 = vector.broadcast %43 : f32 to vector<12x12xf32>
    %45 = arith.addf %42, %44 : vector<12x12xf32>
    %cst_36 = arith.constant 0.000000e+00 : f32
    %46 = vector.broadcast %cst_36 : f32 to vector<12x12xf32>
    %47 = arith.maximumf %45, %46 : vector<12x12xf32>
    %c0_37 = arith.constant 0 : index
    %c0_38 = arith.constant 0 : index
    %48 = vector.load %arg8[%c0_37, %c0_38] : memref<7x12xf32, #tpu.memory_space<vmem>>, vector<7x12xf32>
    %c0_39 = arith.constant 0 : index
    %c0_40 = arith.constant 0 : index
    %49 = vector.load %arg9[%c0_39, %c0_40] : memref<12x7xf32, #tpu.memory_space<vmem>>, vector<12x7xf32>
    %cst_41 = arith.constant dense<0.000000e+00> : vector<12x7xf32>
    %50 = tpu.matmul %39, %49, %cst_41 {dimension_numbers = #tpu.dot_dimension_numbers<[1], [0], [0], [1], [0, 0, 1, 1], [], []>} : vector<12x12xf32>, vector<12x7xf32>, vector<12x7xf32> -> vector<12x7xf32>
    %cst_42 = arith.constant dense<0.000000e+00> : vector<7x7xf32>
    %51 = tpu.matmul %48, %50, %cst_42 {dimension_numbers = #tpu.dot_dimension_numbers<[1], [0], [0], [1], [0, 0, 1, 1], [], []>} : vector<7x12xf32>, vector<12x7xf32>, vector<7x7xf32> -> vector<7x7xf32>
    %cst_43 = arith.constant dense<0.000000e+00> : vector<12x7xf32>
    %52 = tpu.matmul %47, %49, %cst_43 {dimension_numbers = #tpu.dot_dimension_numbers<[1], [0], [0], [1], [0, 0, 1, 1], [], []>} : vector<12x12xf32>, vector<12x7xf32>, vector<12x7xf32> -> vector<12x7xf32>
    %cst_44 = arith.constant dense<0.000000e+00> : vector<7x7xf32>
    %53 = tpu.matmul %48, %52, %cst_44 {dimension_numbers = #tpu.dot_dimension_numbers<[1], [0], [0], [1], [0, 0, 1, 1], [], []>} : vector<7x12xf32>, vector<12x7xf32>, vector<7x7xf32> -> vector<7x7xf32>
    %c0_45 = arith.constant 0 : index
    %c0_46 = arith.constant 0 : index
    %54 = memref.load %arg4[%c0_45, %c0_46] : memref<4x3xf32, #tpu.memory_space<smem>>
    %55 = vector.broadcast %54 : f32 to vector<7x7xf32>
    %56 = arith.mulf %51, %55 : vector<7x7xf32>
    %c0_47 = arith.constant 0 : index
    %c1_48 = arith.constant 1 : index
    %57 = memref.load %arg4[%c0_47, %c1_48] : memref<4x3xf32, #tpu.memory_space<smem>>
    %58 = vector.broadcast %57 : f32 to vector<7x7xf32>
    %59 = arith.mulf %53, %58 : vector<7x7xf32>
    %60 = arith.addf %56, %59 : vector<7x7xf32>
    %c0_49 = arith.constant 0 : index
    %c2_50 = arith.constant 2 : index
    %61 = memref.load %arg4[%c0_49, %c2_50] : memref<4x3xf32, #tpu.memory_space<smem>>
    %62 = vector.broadcast %61 : f32 to vector<7x7xf32>
    %63 = arith.addf %60, %62 : vector<7x7xf32>
    %cst_51 = arith.constant 0.000000e+00 : f32
    %64 = vector.broadcast %cst_51 : f32 to vector<7x7xf32>
    %65 = arith.maximumf %63, %64 : vector<7x7xf32>
    %c1_52 = arith.constant 1 : index
    %c0_53 = arith.constant 0 : index
    %66 = memref.load %arg4[%c1_52, %c0_53] : memref<4x3xf32, #tpu.memory_space<smem>>
    %67 = vector.broadcast %66 : f32 to vector<7x7xf32>
    %68 = arith.mulf %51, %67 : vector<7x7xf32>
    %c1_54 = arith.constant 1 : index
    %c1_55 = arith.constant 1 : index
    %69 = memref.load %arg4[%c1_54, %c1_55] : memref<4x3xf32, #tpu.memory_space<smem>>
    %70 = vector.broadcast %69 : f32 to vector<7x7xf32>
    %71 = arith.mulf %53, %70 : vector<7x7xf32>
    %72 = arith.addf %68, %71 : vector<7x7xf32>
    %c1_56 = arith.constant 1 : index
    %c2_57 = arith.constant 2 : index
    %73 = memref.load %arg4[%c1_56, %c2_57] : memref<4x3xf32, #tpu.memory_space<smem>>
    %74 = vector.broadcast %73 : f32 to vector<7x7xf32>
    %75 = arith.addf %72, %74 : vector<7x7xf32>
    %cst_58 = arith.constant 0.000000e+00 : f32
    %76 = vector.broadcast %cst_58 : f32 to vector<7x7xf32>
    %77 = arith.maximumf %75, %76 : vector<7x7xf32>
    %c2_59 = arith.constant 2 : index
    %c0_60 = arith.constant 0 : index
    %78 = memref.load %arg4[%c2_59, %c0_60] : memref<4x3xf32, #tpu.memory_space<smem>>
    %79 = vector.broadcast %78 : f32 to vector<7x7xf32>
    %80 = arith.mulf %51, %79 : vector<7x7xf32>
    %c2_61 = arith.constant 2 : index
    %c1_62 = arith.constant 1 : index
    %81 = memref.load %arg4[%c2_61, %c1_62] : memref<4x3xf32, #tpu.memory_space<smem>>
    %82 = vector.broadcast %81 : f32 to vector<7x7xf32>
    %83 = arith.mulf %53, %82 : vector<7x7xf32>
    %84 = arith.addf %80, %83 : vector<7x7xf32>
    %c2_63 = arith.constant 2 : index
    %c2_64 = arith.constant 2 : index
    %85 = memref.load %arg4[%c2_63, %c2_64] : memref<4x3xf32, #tpu.memory_space<smem>>
    %86 = vector.broadcast %85 : f32 to vector<7x7xf32>
    %87 = arith.addf %84, %86 : vector<7x7xf32>
    %cst_65 = arith.constant 0.000000e+00 : f32
    %88 = vector.broadcast %cst_65 : f32 to vector<7x7xf32>
    %89 = arith.maximumf %87, %88 : vector<7x7xf32>
    %c3_66 = arith.constant 3 : index
    %c0_67 = arith.constant 0 : index
    %90 = memref.load %arg4[%c3_66, %c0_67] : memref<4x3xf32, #tpu.memory_space<smem>>
    %91 = vector.broadcast %90 : f32 to vector<7x7xf32>
    %92 = arith.mulf %51, %91 : vector<7x7xf32>
    %c3_68 = arith.constant 3 : index
    %c1_69 = arith.constant 1 : index
    %93 = memref.load %arg4[%c3_68, %c1_69] : memref<4x3xf32, #tpu.memory_space<smem>>
    %94 = vector.broadcast %93 : f32 to vector<7x7xf32>
    %95 = arith.mulf %53, %94 : vector<7x7xf32>
    %96 = arith.addf %92, %95 : vector<7x7xf32>
    %c3_70 = arith.constant 3 : index
    %c2_71 = arith.constant 2 : index
    %97 = memref.load %arg4[%c3_70, %c2_71] : memref<4x3xf32, #tpu.memory_space<smem>>
    %98 = vector.broadcast %97 : f32 to vector<7x7xf32>
    %99 = arith.addf %96, %98 : vector<7x7xf32>
    %cst_72 = arith.constant 0.000000e+00 : f32
    %100 = vector.broadcast %cst_72 : f32 to vector<7x7xf32>
    %101 = arith.maximumf %99, %100 : vector<7x7xf32>
    %c0_73 = arith.constant 0 : index
    %c0_74 = arith.constant 0 : index
    %102 = vector.load %arg10[%c0_73, %c0_74] : memref<5x7xf32, #tpu.memory_space<vmem>>, vector<5x7xf32>
    %c0_75 = arith.constant 0 : index
    %c0_76 = arith.constant 0 : index
    %103 = vector.load %arg11[%c0_75, %c0_76] : memref<7x5xf32, #tpu.memory_space<vmem>>, vector<7x5xf32>
    %cst_77 = arith.constant dense<0.000000e+00> : vector<7x5xf32>
    %104 = tpu.matmul %65, %103, %cst_77 {dimension_numbers = #tpu.dot_dimension_numbers<[1], [0], [0], [1], [0, 0, 1, 1], [], []>} : vector<7x7xf32>, vector<7x5xf32>, vector<7x5xf32> -> vector<7x5xf32>
    %cst_78 = arith.constant dense<0.000000e+00> : vector<5x5xf32>
    %105 = tpu.matmul %102, %104, %cst_78 {dimension_numbers = #tpu.dot_dimension_numbers<[1], [0], [0], [1], [0, 0, 1, 1], [], []>} : vector<5x7xf32>, vector<7x5xf32>, vector<5x5xf32> -> vector<5x5xf32>
    %cst_79 = arith.constant dense<0.000000e+00> : vector<7x5xf32>
    %106 = tpu.matmul %77, %103, %cst_79 {dimension_numbers = #tpu.dot_dimension_numbers<[1], [0], [0], [1], [0, 0, 1, 1], [], []>} : vector<7x7xf32>, vector<7x5xf32>, vector<7x5xf32> -> vector<7x5xf32>
    %cst_80 = arith.constant dense<0.000000e+00> : vector<5x5xf32>
    %107 = tpu.matmul %102, %106, %cst_80 {dimension_numbers = #tpu.dot_dimension_numbers<[1], [0], [0], [1], [0, 0, 1, 1], [], []>} : vector<5x7xf32>, vector<7x5xf32>, vector<5x5xf32> -> vector<5x5xf32>
    %cst_81 = arith.constant dense<0.000000e+00> : vector<7x5xf32>
    %108 = tpu.matmul %89, %103, %cst_81 {dimension_numbers = #tpu.dot_dimension_numbers<[1], [0], [0], [1], [0, 0, 1, 1], [], []>} : vector<7x7xf32>, vector<7x5xf32>, vector<7x5xf32> -> vector<7x5xf32>
    %cst_82 = arith.constant dense<0.000000e+00> : vector<5x5xf32>
    %109 = tpu.matmul %102, %108, %cst_82 {dimension_numbers = #tpu.dot_dimension_numbers<[1], [0], [0], [1], [0, 0, 1, 1], [], []>} : vector<5x7xf32>, vector<7x5xf32>, vector<5x5xf32> -> vector<5x5xf32>
    %cst_83 = arith.constant dense<0.000000e+00> : vector<7x5xf32>
    %110 = tpu.matmul %101, %103, %cst_83 {dimension_numbers = #tpu.dot_dimension_numbers<[1], [0], [0], [1], [0, 0, 1, 1], [], []>} : vector<7x7xf32>, vector<7x5xf32>, vector<7x5xf32> -> vector<7x5xf32>
    %cst_84 = arith.constant dense<0.000000e+00> : vector<5x5xf32>
    %111 = tpu.matmul %102, %110, %cst_84 {dimension_numbers = #tpu.dot_dimension_numbers<[1], [0], [0], [1], [0, 0, 1, 1], [], []>} : vector<5x7xf32>, vector<7x5xf32>, vector<5x5xf32> -> vector<5x5xf32>
    %c0_85 = arith.constant 0 : index
    %c0_86 = arith.constant 0 : index
    %112 = memref.load %arg5[%c0_85, %c0_86] : memref<8x5xf32, #tpu.memory_space<smem>>
    %113 = vector.broadcast %112 : f32 to vector<5x5xf32>
    %114 = arith.mulf %105, %113 : vector<5x5xf32>
    %c0_87 = arith.constant 0 : index
    %c1_88 = arith.constant 1 : index
    %115 = memref.load %arg5[%c0_87, %c1_88] : memref<8x5xf32, #tpu.memory_space<smem>>
    %116 = vector.broadcast %115 : f32 to vector<5x5xf32>
    %117 = arith.mulf %107, %116 : vector<5x5xf32>
    %118 = arith.addf %114, %117 : vector<5x5xf32>
    %c0_89 = arith.constant 0 : index
    %c2_90 = arith.constant 2 : index
    %119 = memref.load %arg5[%c0_89, %c2_90] : memref<8x5xf32, #tpu.memory_space<smem>>
    %120 = vector.broadcast %119 : f32 to vector<5x5xf32>
    %121 = arith.mulf %109, %120 : vector<5x5xf32>
    %122 = arith.addf %118, %121 : vector<5x5xf32>
    %c0_91 = arith.constant 0 : index
    %c3_92 = arith.constant 3 : index
    %123 = memref.load %arg5[%c0_91, %c3_92] : memref<8x5xf32, #tpu.memory_space<smem>>
    %124 = vector.broadcast %123 : f32 to vector<5x5xf32>
    %125 = arith.mulf %111, %124 : vector<5x5xf32>
    %126 = arith.addf %122, %125 : vector<5x5xf32>
    %c0_93 = arith.constant 0 : index
    %c4_94 = arith.constant 4 : index
    %127 = memref.load %arg5[%c0_93, %c4_94] : memref<8x5xf32, #tpu.memory_space<smem>>
    %128 = vector.broadcast %127 : f32 to vector<5x5xf32>
    %129 = arith.addf %126, %128 : vector<5x5xf32>
    %cst_95 = arith.constant 0.000000e+00 : f32
    %130 = vector.broadcast %cst_95 : f32 to vector<5x5xf32>
    %131 = arith.maximumf %129, %130 : vector<5x5xf32>
    %c1_96 = arith.constant 1 : index
    %c0_97 = arith.constant 0 : index
    %132 = memref.load %arg5[%c1_96, %c0_97] : memref<8x5xf32, #tpu.memory_space<smem>>
    %133 = vector.broadcast %132 : f32 to vector<5x5xf32>
    %134 = arith.mulf %105, %133 : vector<5x5xf32>
    %c1_98 = arith.constant 1 : index
    %c1_99 = arith.constant 1 : index
    %135 = memref.load %arg5[%c1_98, %c1_99] : memref<8x5xf32, #tpu.memory_space<smem>>
    %136 = vector.broadcast %135 : f32 to vector<5x5xf32>
    %137 = arith.mulf %107, %136 : vector<5x5xf32>
    %138 = arith.addf %134, %137 : vector<5x5xf32>
    %c1_100 = arith.constant 1 : index
    %c2_101 = arith.constant 2 : index
    %139 = memref.load %arg5[%c1_100, %c2_101] : memref<8x5xf32, #tpu.memory_space<smem>>
    %140 = vector.broadcast %139 : f32 to vector<5x5xf32>
    %141 = arith.mulf %109, %140 : vector<5x5xf32>
    %142 = arith.addf %138, %141 : vector<5x5xf32>
    %c1_102 = arith.constant 1 : index
    %c3_103 = arith.constant 3 : index
    %143 = memref.load %arg5[%c1_102, %c3_103] : memref<8x5xf32, #tpu.memory_space<smem>>
    %144 = vector.broadcast %143 : f32 to vector<5x5xf32>
    %145 = arith.mulf %111, %144 : vector<5x5xf32>
    %146 = arith.addf %142, %145 : vector<5x5xf32>
    %c1_104 = arith.constant 1 : index
    %c4_105 = arith.constant 4 : index
    %147 = memref.load %arg5[%c1_104, %c4_105] : memref<8x5xf32, #tpu.memory_space<smem>>
    %148 = vector.broadcast %147 : f32 to vector<5x5xf32>
    %149 = arith.addf %146, %148 : vector<5x5xf32>
    %cst_106 = arith.constant 0.000000e+00 : f32
    %150 = vector.broadcast %cst_106 : f32 to vector<5x5xf32>
    %151 = arith.maximumf %149, %150 : vector<5x5xf32>
    %c2_107 = arith.constant 2 : index
    %c0_108 = arith.constant 0 : index
    %152 = memref.load %arg5[%c2_107, %c0_108] : memref<8x5xf32, #tpu.memory_space<smem>>
    %153 = vector.broadcast %152 : f32 to vector<5x5xf32>
    %154 = arith.mulf %105, %153 : vector<5x5xf32>
    %c2_109 = arith.constant 2 : index
    %c1_110 = arith.constant 1 : index
    %155 = memref.load %arg5[%c2_109, %c1_110] : memref<8x5xf32, #tpu.memory_space<smem>>
    %156 = vector.broadcast %155 : f32 to vector<5x5xf32>
    %157 = arith.mulf %107, %156 : vector<5x5xf32>
    %158 = arith.addf %154, %157 : vector<5x5xf32>
    %c2_111 = arith.constant 2 : index
    %c2_112 = arith.constant 2 : index
    %159 = memref.load %arg5[%c2_111, %c2_112] : memref<8x5xf32, #tpu.memory_space<smem>>
    %160 = vector.broadcast %159 : f32 to vector<5x5xf32>
    %161 = arith.mulf %109, %160 : vector<5x5xf32>
    %162 = arith.addf %158, %161 : vector<5x5xf32>
    %c2_113 = arith.constant 2 : index
    %c3_114 = arith.constant 3 : index
    %163 = memref.load %arg5[%c2_113, %c3_114] : memref<8x5xf32, #tpu.memory_space<smem>>
    %164 = vector.broadcast %163 : f32 to vector<5x5xf32>
    %165 = arith.mulf %111, %164 : vector<5x5xf32>
    %166 = arith.addf %162, %165 : vector<5x5xf32>
    %c2_115 = arith.constant 2 : index
    %c4_116 = arith.constant 4 : index
    %167 = memref.load %arg5[%c2_115, %c4_116] : memref<8x5xf32, #tpu.memory_space<smem>>
    %168 = vector.broadcast %167 : f32 to vector<5x5xf32>
    %169 = arith.addf %166, %168 : vector<5x5xf32>
    %cst_117 = arith.constant 0.000000e+00 : f32
    %170 = vector.broadcast %cst_117 : f32 to vector<5x5xf32>
    %171 = arith.maximumf %169, %170 : vector<5x5xf32>
    %c3_118 = arith.constant 3 : index
    %c0_119 = arith.constant 0 : index
    %172 = memref.load %arg5[%c3_118, %c0_119] : memref<8x5xf32, #tpu.memory_space<smem>>
    %173 = vector.broadcast %172 : f32 to vector<5x5xf32>
    %174 = arith.mulf %105, %173 : vector<5x5xf32>
    %c3_120 = arith.constant 3 : index
    %c1_121 = arith.constant 1 : index
    %175 = memref.load %arg5[%c3_120, %c1_121] : memref<8x5xf32, #tpu.memory_space<smem>>
    %176 = vector.broadcast %175 : f32 to vector<5x5xf32>
    %177 = arith.mulf %107, %176 : vector<5x5xf32>
    %178 = arith.addf %174, %177 : vector<5x5xf32>
    %c3_122 = arith.constant 3 : index
    %c2_123 = arith.constant 2 : index
    %179 = memref.load %arg5[%c3_122, %c2_123] : memref<8x5xf32, #tpu.memory_space<smem>>
    %180 = vector.broadcast %179 : f32 to vector<5x5xf32>
    %181 = arith.mulf %109, %180 : vector<5x5xf32>
    %182 = arith.addf %178, %181 : vector<5x5xf32>
    %c3_124 = arith.constant 3 : index
    %c3_125 = arith.constant 3 : index
    %183 = memref.load %arg5[%c3_124, %c3_125] : memref<8x5xf32, #tpu.memory_space<smem>>
    %184 = vector.broadcast %183 : f32 to vector<5x5xf32>
    %185 = arith.mulf %111, %184 : vector<5x5xf32>
    %186 = arith.addf %182, %185 : vector<5x5xf32>
    %c3_126 = arith.constant 3 : index
    %c4_127 = arith.constant 4 : index
    %187 = memref.load %arg5[%c3_126, %c4_127] : memref<8x5xf32, #tpu.memory_space<smem>>
    %188 = vector.broadcast %187 : f32 to vector<5x5xf32>
    %189 = arith.addf %186, %188 : vector<5x5xf32>
    %cst_128 = arith.constant 0.000000e+00 : f32
    %190 = vector.broadcast %cst_128 : f32 to vector<5x5xf32>
    %191 = arith.maximumf %189, %190 : vector<5x5xf32>
    %c4_129 = arith.constant 4 : index
    %c0_130 = arith.constant 0 : index
    %192 = memref.load %arg5[%c4_129, %c0_130] : memref<8x5xf32, #tpu.memory_space<smem>>
    %193 = vector.broadcast %192 : f32 to vector<5x5xf32>
    %194 = arith.mulf %105, %193 : vector<5x5xf32>
    %c4_131 = arith.constant 4 : index
    %c1_132 = arith.constant 1 : index
    %195 = memref.load %arg5[%c4_131, %c1_132] : memref<8x5xf32, #tpu.memory_space<smem>>
    %196 = vector.broadcast %195 : f32 to vector<5x5xf32>
    %197 = arith.mulf %107, %196 : vector<5x5xf32>
    %198 = arith.addf %194, %197 : vector<5x5xf32>
    %c4_133 = arith.constant 4 : index
    %c2_134 = arith.constant 2 : index
    %199 = memref.load %arg5[%c4_133, %c2_134] : memref<8x5xf32, #tpu.memory_space<smem>>
    %200 = vector.broadcast %199 : f32 to vector<5x5xf32>
    %201 = arith.mulf %109, %200 : vector<5x5xf32>
    %202 = arith.addf %198, %201 : vector<5x5xf32>
    %c4_135 = arith.constant 4 : index
    %c3_136 = arith.constant 3 : index
    %203 = memref.load %arg5[%c4_135, %c3_136] : memref<8x5xf32, #tpu.memory_space<smem>>
    %204 = vector.broadcast %203 : f32 to vector<5x5xf32>
    %205 = arith.mulf %111, %204 : vector<5x5xf32>
    %206 = arith.addf %202, %205 : vector<5x5xf32>
    %c4_137 = arith.constant 4 : index
    %c4_138 = arith.constant 4 : index
    %207 = memref.load %arg5[%c4_137, %c4_138] : memref<8x5xf32, #tpu.memory_space<smem>>
    %208 = vector.broadcast %207 : f32 to vector<5x5xf32>
    %209 = arith.addf %206, %208 : vector<5x5xf32>
    %cst_139 = arith.constant 0.000000e+00 : f32
    %210 = vector.broadcast %cst_139 : f32 to vector<5x5xf32>
    %211 = arith.maximumf %209, %210 : vector<5x5xf32>
    %c5 = arith.constant 5 : index
    %c0_140 = arith.constant 0 : index
    %212 = memref.load %arg5[%c5, %c0_140] : memref<8x5xf32, #tpu.memory_space<smem>>
    %213 = vector.broadcast %212 : f32 to vector<5x5xf32>
    %214 = arith.mulf %105, %213 : vector<5x5xf32>
    %c5_141 = arith.constant 5 : index
    %c1_142 = arith.constant 1 : index
    %215 = memref.load %arg5[%c5_141, %c1_142] : memref<8x5xf32, #tpu.memory_space<smem>>
    %216 = vector.broadcast %215 : f32 to vector<5x5xf32>
    %217 = arith.mulf %107, %216 : vector<5x5xf32>
    %218 = arith.addf %214, %217 : vector<5x5xf32>
    %c5_143 = arith.constant 5 : index
    %c2_144 = arith.constant 2 : index
    %219 = memref.load %arg5[%c5_143, %c2_144] : memref<8x5xf32, #tpu.memory_space<smem>>
    %220 = vector.broadcast %219 : f32 to vector<5x5xf32>
    %221 = arith.mulf %109, %220 : vector<5x5xf32>
    %222 = arith.addf %218, %221 : vector<5x5xf32>
    %c5_145 = arith.constant 5 : index
    %c3_146 = arith.constant 3 : index
    %223 = memref.load %arg5[%c5_145, %c3_146] : memref<8x5xf32, #tpu.memory_space<smem>>
    %224 = vector.broadcast %223 : f32 to vector<5x5xf32>
    %225 = arith.mulf %111, %224 : vector<5x5xf32>
    %226 = arith.addf %222, %225 : vector<5x5xf32>
    %c5_147 = arith.constant 5 : index
    %c4_148 = arith.constant 4 : index
    %227 = memref.load %arg5[%c5_147, %c4_148] : memref<8x5xf32, #tpu.memory_space<smem>>
    %228 = vector.broadcast %227 : f32 to vector<5x5xf32>
    %229 = arith.addf %226, %228 : vector<5x5xf32>
    %cst_149 = arith.constant 0.000000e+00 : f32
    %230 = vector.broadcast %cst_149 : f32 to vector<5x5xf32>
    %231 = arith.maximumf %229, %230 : vector<5x5xf32>
    %c6 = arith.constant 6 : index
    %c0_150 = arith.constant 0 : index
    %232 = memref.load %arg5[%c6, %c0_150] : memref<8x5xf32, #tpu.memory_space<smem>>
    %233 = vector.broadcast %232 : f32 to vector<5x5xf32>
    %234 = arith.mulf %105, %233 : vector<5x5xf32>
    %c6_151 = arith.constant 6 : index
    %c1_152 = arith.constant 1 : index
    %235 = memref.load %arg5[%c6_151, %c1_152] : memref<8x5xf32, #tpu.memory_space<smem>>
    %236 = vector.broadcast %235 : f32 to vector<5x5xf32>
    %237 = arith.mulf %107, %236 : vector<5x5xf32>
    %238 = arith.addf %234, %237 : vector<5x5xf32>
    %c6_153 = arith.constant 6 : index
    %c2_154 = arith.constant 2 : index
    %239 = memref.load %arg5[%c6_153, %c2_154] : memref<8x5xf32, #tpu.memory_space<smem>>
    %240 = vector.broadcast %239 : f32 to vector<5x5xf32>
    %241 = arith.mulf %109, %240 : vector<5x5xf32>
    %242 = arith.addf %238, %241 : vector<5x5xf32>
    %c6_155 = arith.constant 6 : index
    %c3_156 = arith.constant 3 : index
    %243 = memref.load %arg5[%c6_155, %c3_156] : memref<8x5xf32, #tpu.memory_space<smem>>
    %244 = vector.broadcast %243 : f32 to vector<5x5xf32>
    %245 = arith.mulf %111, %244 : vector<5x5xf32>
    %246 = arith.addf %242, %245 : vector<5x5xf32>
    %c6_157 = arith.constant 6 : index
    %c4_158 = arith.constant 4 : index
    %247 = memref.load %arg5[%c6_157, %c4_158] : memref<8x5xf32, #tpu.memory_space<smem>>
    %248 = vector.broadcast %247 : f32 to vector<5x5xf32>
    %249 = arith.addf %246, %248 : vector<5x5xf32>
    %cst_159 = arith.constant 0.000000e+00 : f32
    %250 = vector.broadcast %cst_159 : f32 to vector<5x5xf32>
    %251 = arith.maximumf %249, %250 : vector<5x5xf32>
    %c7 = arith.constant 7 : index
    %c0_160 = arith.constant 0 : index
    %252 = memref.load %arg5[%c7, %c0_160] : memref<8x5xf32, #tpu.memory_space<smem>>
    %253 = vector.broadcast %252 : f32 to vector<5x5xf32>
    %254 = arith.mulf %105, %253 : vector<5x5xf32>
    %c7_161 = arith.constant 7 : index
    %c1_162 = arith.constant 1 : index
    %255 = memref.load %arg5[%c7_161, %c1_162] : memref<8x5xf32, #tpu.memory_space<smem>>
    %256 = vector.broadcast %255 : f32 to vector<5x5xf32>
    %257 = arith.mulf %107, %256 : vector<5x5xf32>
    %258 = arith.addf %254, %257 : vector<5x5xf32>
    %c7_163 = arith.constant 7 : index
    %c2_164 = arith.constant 2 : index
    %259 = memref.load %arg5[%c7_163, %c2_164] : memref<8x5xf32, #tpu.memory_space<smem>>
    %260 = vector.broadcast %259 : f32 to vector<5x5xf32>
    %261 = arith.mulf %109, %260 : vector<5x5xf32>
    %262 = arith.addf %258, %261 : vector<5x5xf32>
    %c7_165 = arith.constant 7 : index
    %c3_166 = arith.constant 3 : index
    %263 = memref.load %arg5[%c7_165, %c3_166] : memref<8x5xf32, #tpu.memory_space<smem>>
    %264 = vector.broadcast %263 : f32 to vector<5x5xf32>
    %265 = arith.mulf %111, %264 : vector<5x5xf32>
    %266 = arith.addf %262, %265 : vector<5x5xf32>
    %c7_167 = arith.constant 7 : index
    %c4_168 = arith.constant 4 : index
    %267 = memref.load %arg5[%c7_167, %c4_168] : memref<8x5xf32, #tpu.memory_space<smem>>
    %268 = vector.broadcast %267 : f32 to vector<5x5xf32>
    %269 = arith.addf %266, %268 : vector<5x5xf32>
    %cst_169 = arith.constant 0.000000e+00 : f32
    %270 = vector.broadcast %cst_169 : f32 to vector<5x5xf32>
    %271 = arith.maximumf %269, %270 : vector<5x5xf32>
    %c0_170 = arith.constant 0 : index
    %c0_171 = arith.constant 0 : index
    %c0_172 = arith.constant 0 : index
    %c0_173 = arith.constant 0 : index
    %272 = vector.load %arg12[%c0_170, %c0_171, %c0_172, %c0_173] : memref<1x8x5x5xf32, #tpu.memory_space<vmem>>, vector<1x1x5x5xf32>
    %273 = vector.shape_cast %272 : vector<1x1x5x5xf32> to vector<5x5xf32>
    %274 = vector.shape_cast %131 : vector<5x5xf32> to vector<1x1x5x5xf32>
    tpu.vector_store %arg12[%c0_170, %c0_171, %c0_172, %c0_173], %274 {strides = array<i32>} : memref<1x8x5x5xf32, #tpu.memory_space<vmem>>, vector<1x1x5x5xf32>,
    %c0_174 = arith.constant 0 : index
    %c1_175 = arith.constant 1 : index
    %c0_176 = arith.constant 0 : index
    %c0_177 = arith.constant 0 : index
    %275 = vector.load %arg12[%c0_174, %c1_175, %c0_176, %c0_177] : memref<1x8x5x5xf32, #tpu.memory_space<vmem>>, vector<1x1x5x5xf32>
    %276 = vector.shape_cast %275 : vector<1x1x5x5xf32> to vector<5x5xf32>
    %277 = vector.shape_cast %151 : vector<5x5xf32> to vector<1x1x5x5xf32>
    tpu.vector_store %arg12[%c0_174, %c1_175, %c0_176, %c0_177], %277 {strides = array<i32>} : memref<1x8x5x5xf32, #tpu.memory_space<vmem>>, vector<1x1x5x5xf32>,
    %c0_178 = arith.constant 0 : index
    %c2_179 = arith.constant 2 : index
    %c0_180 = arith.constant 0 : index
    %c0_181 = arith.constant 0 : index
    %278 = vector.load %arg12[%c0_178, %c2_179, %c0_180, %c0_181] : memref<1x8x5x5xf32, #tpu.memory_space<vmem>>, vector<1x1x5x5xf32>
    %279 = vector.shape_cast %278 : vector<1x1x5x5xf32> to vector<5x5xf32>
    %280 = vector.shape_cast %171 : vector<5x5xf32> to vector<1x1x5x5xf32>
    tpu.vector_store %arg12[%c0_178, %c2_179, %c0_180, %c0_181], %280 {strides = array<i32>} : memref<1x8x5x5xf32, #tpu.memory_space<vmem>>, vector<1x1x5x5xf32>,
    %c0_182 = arith.constant 0 : index
    %c3_183 = arith.constant 3 : index
    %c0_184 = arith.constant 0 : index
    %c0_185 = arith.constant 0 : index
    %281 = vector.load %arg12[%c0_182, %c3_183, %c0_184, %c0_185] : memref<1x8x5x5xf32, #tpu.memory_space<vmem>>, vector<1x1x5x5xf32>
    %282 = vector.shape_cast %281 : vector<1x1x5x5xf32> to vector<5x5xf32>
    %283 = vector.shape_cast %191 : vector<5x5xf32> to vector<1x1x5x5xf32>
    tpu.vector_store %arg12[%c0_182, %c3_183, %c0_184, %c0_185], %283 {strides = array<i32>} : memref<1x8x5x5xf32, #tpu.memory_space<vmem>>, vector<1x1x5x5xf32>,
    %c0_186 = arith.constant 0 : index
    %c4_187 = arith.constant 4 : index
    %c0_188 = arith.constant 0 : index
    %c0_189 = arith.constant 0 : index
    %284 = vector.load %arg12[%c0_186, %c4_187, %c0_188, %c0_189] : memref<1x8x5x5xf32, #tpu.memory_space<vmem>>, vector<1x1x5x5xf32>
    %285 = vector.shape_cast %284 : vector<1x1x5x5xf32> to vector<5x5xf32>
    %286 = vector.shape_cast %211 : vector<5x5xf32> to vector<1x1x5x5xf32>
    tpu.vector_store %arg12[%c0_186, %c4_187, %c0_188, %c0_189], %286 {strides = array<i32>} : memref<1x8x5x5xf32, #tpu.memory_space<vmem>>, vector<1x1x5x5xf32>,
    %c0_190 = arith.constant 0 : index
    %c5_191 = arith.constant 5 : index
    %c0_192 = arith.constant 0 : index
    %c0_193 = arith.constant 0 : index
    %287 = vector.load %arg12[%c0_190, %c5_191, %c0_192, %c0_193] : memref<1x8x5x5xf32, #tpu.memory_space<vmem>>, vector<1x1x5x5xf32>
    %288 = vector.shape_cast %287 : vector<1x1x5x5xf32> to vector<5x5xf32>
    %289 = vector.shape_cast %231 : vector<5x5xf32> to vector<1x1x5x5xf32>
    tpu.vector_store %arg12[%c0_190, %c5_191, %c0_192, %c0_193], %289 {strides = array<i32>} : memref<1x8x5x5xf32, #tpu.memory_space<vmem>>, vector<1x1x5x5xf32>,
    %c0_194 = arith.constant 0 : index
    %c6_195 = arith.constant 6 : index
    %c0_196 = arith.constant 0 : index
    %c0_197 = arith.constant 0 : index
    %290 = vector.load %arg12[%c0_194, %c6_195, %c0_196, %c0_197] : memref<1x8x5x5xf32, #tpu.memory_space<vmem>>, vector<1x1x5x5xf32>
    %291 = vector.shape_cast %290 : vector<1x1x5x5xf32> to vector<5x5xf32>
    %292 = vector.shape_cast %251 : vector<5x5xf32> to vector<1x1x5x5xf32>
    tpu.vector_store %arg12[%c0_194, %c6_195, %c0_196, %c0_197], %292 {strides = array<i32>} : memref<1x8x5x5xf32, #tpu.memory_space<vmem>>, vector<1x1x5x5xf32>,
    %c0_198 = arith.constant 0 : index
    %c7_199 = arith.constant 7 : index
    %c0_200 = arith.constant 0 : index
    %c0_201 = arith.constant 0 : index
    %293 = vector.load %arg12[%c0_198, %c7_199, %c0_200, %c0_201] : memref<1x8x5x5xf32, #tpu.memory_space<vmem>>, vector<1x1x5x5xf32>
    %294 = vector.shape_cast %293 : vector<1x1x5x5xf32> to vector<5x5xf32>
    %295 = vector.shape_cast %271 : vector<5x5xf32> to vector<1x1x5x5xf32>
    tpu.vector_store %arg12[%c0_198, %c7_199, %c0_200, %c0_201], %295 {strides = array<i32>} : memref<1x8x5x5xf32, #tpu.memory_space<vmem>>, vector<1x1x5x5xf32>,
    return
  }
  func.func @transform_0(%arg0: i32) -> (i32, i32, i32, i32) {
    %c0_i32 = arith.constant 0 : i32
    %c0_i32_0 = arith.constant 0 : i32
    %c0_i32_1 = arith.constant 0 : i32
    %c0_i32_2 = arith.constant 0 : i32
    return %arg0, %c0_i32, %c0_i32_0, %c0_i32_1 : i32, i32, i32, i32
  }
  func.func @transform_1(%arg0: i32) -> (i32, i32) {
    %c0_i32 = arith.constant 0 : i32
    %c0_i32_0 = arith.constant 0 : i32
    %c0_i32_1 = arith.constant 0 : i32
    return %c0_i32, %c0_i32_0 : i32, i32
  }
  func.func @transform_2(%arg0: i32) -> (i32, i32) {
    %c0_i32 = arith.constant 0 : i32
    %c0_i32_0 = arith.constant 0 : i32
    %c0_i32_1 = arith.constant 0 : i32
    return %c0_i32, %c0_i32_0 : i32, i32
  }
  func.func @transform_3(%arg0: i32) -> (i32, i32) {
    %c0_i32 = arith.constant 0 : i32
    %c0_i32_0 = arith.constant 0 : i32
    %c0_i32_1 = arith.constant 0 : i32
    return %c0_i32, %c0_i32_0 : i32, i32
  }
  func.func @transform_4(%arg0: i32) -> (i32, i32) {
    %c0_i32 = arith.constant 0 : i32
    %c0_i32_0 = arith.constant 0 : i32
    %c0_i32_1 = arith.constant 0 : i32
    return %c0_i32, %c0_i32_0 : i32, i32
  }
  func.func @transform_5(%arg0: i32) -> (i32, i32) {
    %c0_i32 = arith.constant 0 : i32
    %c0_i32_0 = arith.constant 0 : i32
    %c0_i32_1 = arith.constant 0 : i32
    return %c0_i32, %c0_i32_0 : i32, i32
  }
  func.func @transform_6(%arg0: i32) -> (i32, i32) {
    %c0_i32 = arith.constant 0 : i32
    %c0_i32_0 = arith.constant 0 : i32
    %c0_i32_1 = arith.constant 0 : i32
    return %c0_i32, %c0_i32_0 : i32, i32
  }
  func.func @transform_7(%arg0: i32) -> (i32, i32) {
    %c0_i32 = arith.constant 0 : i32
    %c0_i32_0 = arith.constant 0 : i32
    %c0_i32_1 = arith.constant 0 : i32
    return %c0_i32, %c0_i32_0 : i32, i32
  }
  func.func @transform_8(%arg0: i32) -> (i32, i32) {
    %c0_i32 = arith.constant 0 : i32
    %c0_i32_0 = arith.constant 0 : i32
    %c0_i32_1 = arith.constant 0 : i32
    return %c0_i32, %c0_i32_0 : i32, i32
  }
  func.func @transform_9(%arg0: i32) -> (i32, i32) {
    %c0_i32 = arith.constant 0 : i32
    %c0_i32_0 = arith.constant 0 : i32
    %c0_i32_1 = arith.constant 0 : i32
    return %c0_i32, %c0_i32_0 : i32, i32
  }
  func.func @transform_10(%arg0: i32) -> (i32, i32) {
    %c0_i32 = arith.constant 0 : i32
    %c0_i32_0 = arith.constant 0 : i32
    %c0_i32_1 = arith.constant 0 : i32
    return %c0_i32, %c0_i32_0 : i32, i32
  }
  func.func @transform_11(%arg0: i32) -> (i32, i32, i32, i32) {
    %c0_i32 = arith.constant 0 : i32
    %c0_i32_0 = arith.constant 0 : i32
    %c0_i32_1 = arith.constant 0 : i32
    %c0_i32_2 = arith.constant 0 : i32
    return %arg0, %c0_i32, %c0_i32_0, %c0_i32_1 : i32, i32, i32, i32
  }
}

</mosaic_0001>

<bundles_post_ra>
// kernel: tpu_custom_call.1
= control target key start
LH: loop header
LB: loop body
LE: loop exit
PB: predicated region body
PF: predicated region fallthrough
CT: control target
= control target key end

     0   :  { %s2189_s0 = inlined_call_operand.hbm [shape: f32[2,4,16,16], index: 0, kind: input, shape index: {}]   ;;  %s2190_s1 = inlined_call_operand.hbm [shape: f32[1,5], index: 1, kind: input, shape index: {}]   ;;  %s2191_s2 = inlined_call_operand.hbm [shape: f32[2,2], index: 2, kind: input, shape index: {}]   ;;  %s2192_s3 = inlined_call_operand.hbm [shape: f32[4,3], index: 3, kind: input, shape index: {}]   ;;  %s2193_s4 = inlined_call_operand.vmem [shape: f32[8,5], index: 4, kind: input, shape index: {}]   ;;  %s2194_s5 = inlined_call_operand.vmem [shape: f32[12,16], index: 5, kind: input, shape index: {}]   ;;  %s2195_s6 = inlined_call_operand.hbm [shape: f32[16,12], index: 6, kind: input, shape index: {}]   ;;  %s2196_s7 = inlined_call_operand.hbm [shape: f32[7,12], index: 7, kind: input, shape index: {}]   ;;  %s2197_s8 = inlined_call_operand.vmem [shape: f32[12,7], index: 8, kind: input, shape index: {}]   ;;  %s2198_s9 = inlined_call_operand.vmem [shape: f32[5,7], index: 9, kind: input, shape index: {}]   ;;  %s2199_s10 = inlined_call_operand.hbm [shape: f32[7,5], index: 10, kind: input, shape index: {}]   ;;  %s2200_s11 = inlined_call_operand.vmem [shape: f32[2,8,5,5], index: 11, kind: output, shape index: {}]  }
   0x1   :  { %2207 = sst [smem:[#allocation26_spill]] %s2189_s0 }
   0x2   :  { %2208 = sst [smem:[#allocation27_spill]] %s2190_s1 }
   0x3   :  { %2209 = sst [smem:[#allocation28_spill]] %s2191_s2 }
   0x4   :  { %2210 = sst [smem:[#allocation29_spill]] %s2192_s3 }
   0x5   :  { %2211 = sst [smem:[#allocation30_spill]] %s2193_s4 }
   0x6   :  { %2212 = sst [smem:[#allocation31_spill]] %s2194_s5 }
   0x7   :  { %2213 = sst [smem:[#allocation32_spill]] %s2195_s6 }
   0x8   :  { %2214 = sst [smem:[#allocation33_spill]] %s2196_s7 }
   0x9   :  { %2215 = sst [smem:[#allocation34_spill]] %s2197_s8 }
   0xa   :  { %2216 = sst [smem:[#allocation35_spill]] %s2198_s9 }
   0xb   :  { %2217 = sst [smem:[#allocation36_spill]] %s2199_s10 }
   0xc   :  { %2218 = sst [smem:[#allocation37_spill]] %s2200_s11 }
   0xd   :  { %16 = vsyncpa [#allocation3], 0 }
   0xe   :  { %18 = vsyncpa [#allocation3 + $0x1], 0 }
   0xf   :  { %19 = vsyncpa [#allocation4], 0 }
  0x10   :  { %20 = vsyncpa [#allocation8], 0 }
  0x11   :  { %21 = vsyncpa [#allocation5], 0 }
  0x12   :  { %22 = vsyncpa [#allocation12], 0 }
  0x13   :  { %23 = vsyncpa [#allocation15], 0  ;;  %s1834_s17 = smov 0   ;;  %s1836_s18 = smov 0  }
  0x14   :  { %s1838_s19 = smov 0   ;;  %s1840_s20 = smov 0  }
  0x15 LB: > { %2219 = sst [smem:[#allocation22_spill]] %s1755_s18  ;;  %s1858_s24 = sadd.s32 4294967295, %s1763_s20   ;;  %s1763_s20 = sphi %s1840_s20, %s2241_s20   ;;  %s1759_s19 = sphi %s1838_s19, %s2244_s19   ;;  %s1755_s18 = sphi %s1836_s18, %s2243_s18   ;;  %s1751_s17 = sphi %s1834_s17, %s2242_s17  }
  0x16   : > { %2220 = sst [smem:[#allocation23_spill]] %s1759_s19  ;;  %p1290_p0 = scmp.ge.s32.totalorder %s1763_s20, 1 }
  0x17   : > { %s2221_s2 = sld [smem:[#allocation28_spill]]  ;;  %p50_p1 = scmp.eq.s32.totalorder %s1858_s24, 0 }
  0x18   : > { %p296_p2 = scmp.lt.s32.totalorder %s1763_s20, 3  ;;  %s2223_s6 = sld [smem:[#allocation32_spill]] }
  0x19   : > { %s1765_s29 = smov [#allocation11]   ;;  %s2225_s1 = sld [smem:[#allocation27_spill]] }
  0x1a   : > { %p1863_p3 = pnand %p1290_p0, %p296_p2  ;;  %s352_s30 = sshll.u32 %s1765_s29, 4  ;;  %s353_s30 = int_to_ptr.vmem [resolvable:$true] %s352_s30 }
  0x1b   : > { %s1766_s16 = smov [#allocation7]   ;;  %s2201_s21 = smov 128  }
  0x1c   : > { %p1447_p4 = pneg %p1863_p3  ;;  %s2202_s22 = smov 8  }
  0x1d   : > { %s318_s23 = sshll.u32 %s2221_s2, 4  ;;  %s2226_s3 = sld [smem:[#allocation29_spill]]  ;;  %s319_s23 = int_to_ptr.hbm [resolvable:$true] %s318_s23 }
  0x1e   : > { %s350_s28 = sshll.u32 %s2223_s6, 4  ;;  %p1874_p5 = pnand %p1447_p4, %p50_p1  ;;  %s351_s28 = int_to_ptr.hbm [resolvable:$true] %s350_s28 }
  0x1f   : > { %s308_s15 = sshll.u32 %s2225_s1, 4  ;;  %s1769_s2 = smov [#allocation6]   ;;  %s309_s15 = int_to_ptr.hbm [resolvable:$true] %s308_s15 }
  0x20   : > { %1453 = dma.hbm_to_smem (!%p1874_p5), %s319_s23, 32, %s1766_s16, [#allocation8]  }
  0x21   : > { %1462 = dma.hbm_to_vmem [thread:$0]  (!%p1874_p5), %s351_s28, 256, %s353_s30, [#allocation12], %s2201_s21, %s2201_s21, %s2202_s22  }
  0x22   : > { %1450 = dma.hbm_to_smem (!%p1874_p5), %s309_s15, 16, %s1769_s2, [#allocation4]  }
  0x23   : > { %s328_s29 = sshll.u32 %s2226_s3, 4  ;;  %s1770_s13 = smov [#allocation9]   ;;  %s329_s29 = int_to_ptr.hbm [resolvable:$true] %s328_s29 }
  0x24   : > { %1456 = dma.hbm_to_smem (!%p1874_p5), %s329_s29, 64, %s1770_s13, [#allocation8]  }
  0x25   : > { %s2227_s4 = sld [smem:[#allocation30_spill]]  ;;  %s1771_s27 = smov [#allocation10]  }
  0x26   : > { %s2228_s7 = sld [smem:[#allocation33_spill]]  ;;  %s1772_s2 = smov [#allocation13]  }
  0x27   : > { %s367_s15 = sshll.u32 %s1772_s2, 4  ;;  %s2229_s10 = sld [smem:[#allocation36_spill]]  ;;  %s368_s15 = int_to_ptr.vmem [resolvable:$true] %s367_s15 }
  0x28   : > { %s1773_s14 = smov [#allocation14]   ;;  %s1911_s28 = sadd.s32 1, %s1763_s20  }
  0x29   : > { %2230 = sst [smem:[#allocation24_spill]] %s1911_s28  ;;  %s33_s30 = ssub.s32 %s1763_s20, %s1911_s28 }
  0x2a   : > { %p34_p6 = scmp.eq.s32.totalorder %s33_s30, 0  ;;  %p43_p7 = scmp.ne.s32.totalorder %s1759_s19, %s1755_s18 }
  0x2b   : > { %s338_s16 = sshll.u32 %s2227_s4, 4  ;;  %p44_p8 = scmp.eq.s32.totalorder %s1763_s20, 0  ;;  %s339_s16 = int_to_ptr.vmem [resolvable:$true] %s338_s16 }
  0x2c   : > { %s365_s26 = sshll.u32 %s2228_s7, 4  ;;  %p49_p9 = scmp.ne.s32.totalorder %s1755_s18, %s1751_s17  ;;  %s366_s26 = int_to_ptr.hbm [resolvable:$true] %s365_s26 }
  0x2d   : > { %1459 = dma.vmem_to_smem (!%p1874_p5), %s339_s16, 128, %s1771_s27, [#allocation5]  }
  0x2e   : > { %s383_s23 = sshll.u32 %s2229_s10, 4  ;;  %s385_s16 = sshll.u32 %s1773_s14, 4  ;;  %s384_s23 = int_to_ptr.hbm [resolvable:$true] %s383_s23  ;;  %s386_s16 = int_to_ptr.vmem [resolvable:$true] %s385_s16 }
  0x2f   : > { %1465 = dma.hbm_to_vmem [thread:$0]  (!%p1874_p5), %s366_s26, 128, %s368_s15, [#allocation12]  }
  0x30   : > { %1468 = dma.hbm_to_vmem [thread:$0]  (!%p1874_p5), %s384_s23, 128, %s386_s16, [#allocation15]  }
  0x31   : > { %s36_s27 = sadd.s32 1, %s1759_s19  ;;  %p45_p10 = por %p44_p8, %p43_p7 }
  0x32   : > { %s1922_s2 = scalar_select %p34_p6, %s1759_s19, %s36_s27  }
  0x33   : > { %p1926_p11 = por %p50_p1, %p49_p9  ;;  %p1480_p12 = scmp.lt.s32.totalorder %s1763_s20, 2 }
  0x34   : > { %2231 = sst [smem:[#allocation25_spill]] %s1922_s2  ;;  %s396_s12 = sand.u32 1, %s1759_s19  }
  0x35   : > { %s1299_s15 = sshll.u32 %s396_s12, 6  ;;  %s1415_s29 = sshll.u32 %s1763_s20, 6 }
  0x36   : > { %s2233_s0 = sld [smem:[#allocation26_spill]]  ;;  %s400_s16 = scalar_lea.vmem [#allocation2], %s1299_s15 }
  0x37   : > { %s408_s30 = sshll.u32 %s400_s16, 4  ;;  %p1936_p13 = pnand %p1480_p12, %p45_p10  ;;  %s409_s30 = int_to_ptr.vmem [resolvable:$true] %s408_s30 }
  0x38   : > { %s397_s27 = scalar_lea.sflag [#allocation3], %s396_s12 }
  0x39   : > { %p1683_p2 = pneg %p1936_p13 }
  0x3c   : > { %s405_s14 = scalar_lea.hbm %s2233_s0, %s1415_s29  ;;  %s1686_s29 = scalar_lea.hbm %s2233_s0, 128 }
  0x3d   : > { %s406_s21 = sshll.u32 %s405_s14, 4  ;;  %s407_s21 = int_to_ptr.hbm [resolvable:$true] %s406_s21 }
  0x3e   : > { %s1679_s22 = sshra.s32 %s407_s21, 4  ;;  %s1680_s22 = int_to_ptr.hbm [resolvable:$true] %s1679_s22 }
  0x3f   : > { %s1681_s1 = scalar_lea.hbm %s1680_s22, 64  ;;  %p1687_p6 = scmp.lt.s32.totalorder %s1680_s22, %s2233_s0 }
  0x40   : > { %p1682_p0 = scmp.ne.s32.totalorder %s1680_s22, %s1681_s1  ;;  %p1688_p7 = scmp.lt.s32.totalorder %s1686_s29, %s1681_s1 }
  0x42   : > { %p1684_p4 = pnand %p1683_p2, %p1682_p0  ;;  %p1689_p8 = por %p1688_p7, %p1687_p6 }
  0x44   : > { %p1685_p5 = pneg %p1684_p4 }
  0x46   : > { %p1690_p9 = pnand %p1689_p8, %p1685_p5 }
  0x48   : > { %1693 = shalt.err (!%p1690_p9)
}
  0x49   : > { %s2235_s12 = smov 8   ;;  %s2236_s14 = smov 128  }
  0x4a   : > { %1472 = dma.hbm_to_vmem [thread:$0]  (!%p1936_p13), %s407_s21, 1024, %s409_s30, %s397_s27, %s2236_s14, %s2236_s14, %s2235_s12  }
  0x4b   : > { %420 = sbr.rel (%p1863_p3) target bundleno = 1228 (0x4cc), region = 64  ;;  %s422_s16 = sand.u32 (!%p1863_p3), 1, %s1755_s18  }
  0x4c   : > { %s1303_s20 = sshll.u32 (!%p1863_p3), %s422_s16, 6  ;;  %s423_s15 = scalar_lea.sflag (!%p1863_p3), [#allocation3], %s422_s16 }
  0x4d   : > { %s1956_s13 = scalar_lea.vmem (!%p1863_p3), [#allocation2], %s1303_s20 }
  0x50   : > { %1726 = dma.done.wait (%p1926_p11), %s423_s15, 1024  }
  0x51   : > { %1728 = vsyncadd (%p1926_p11), %s423_s15, 4294966272 }
  0x52   : > { %1730 = dma.done.wait (%p50_p1), [#allocation4], 16  }
  0x53   : > { %1732 = vsyncadd (%p50_p1), [#allocation4], 4294967280 }
  0x54   : > { %1734 = dma.done.wait (%p50_p1), [#allocation8], 96  }
  0x55   : > { %1736 = vsyncadd (%p50_p1), [#allocation8], 4294967200 }
  0x56   : > { %1738 = dma.done.wait (%p50_p1), [#allocation5], 128  }
  0x57   : > { %1740 = vsyncadd (%p50_p1), [#allocation5], 4294967168 }
  0x58   : > { %1742 = dma.done.wait (%p50_p1), [#allocation12], 384  }
  0x59   : > { %1744 = vsyncadd (%p50_p1), [#allocation12], 4294966912 }
  0x5a   : > { %1746 = dma.done.wait (%p50_p1), [#allocation15], 128  }
  0x5b   : > { %1748 = vsyncadd (%p50_p1), [#allocation15], 4294967168 }
  0x5c   : > { %467 = sfence }
  0x5d   : > { %v549_v0 = vld [vmem:[#allocation11 + $0x8] sm:$0xff]  ;;  %v548_v1 = vld [vmem:[#allocation11] sm:$0xff]  ;;  %s518_s1 = sld [smem:[#allocation6]]  ;;  %v1313_v4 = vld [vmem:[%s1956_s13 + $0x10] sm:$0xff]  ;;  %vm550_vm0 = vcmask 130048   ;;  %vm639_vm1 = vcmask 1043456  }
  0x5e   : > { %571 = vmatpush.msra.mxu0 %v549_v0  ;;  %s1319_s25 = sld [smem:[#allocation6 + $0x1]]  ;;  %v507_v2 = vld [vmem:[%s1956_s13] sm:$0xff]  ;;  %v508_v3 = vld [vmem:[%s1956_s13 + $0x8] sm:$0xff]  ;;  %v1314_v5 = vld [vmem:[%s1956_s13 + $0x18] sm:$0xff]  ;;  %vm632_vm2 = vcmask 97280   ;;  %vm794_vm3 = vcmask 1046528  }
  0x5f   : > { %s1320_s21 = sld [smem:[#allocation6 + $0x2]]  ;;  %v1315_v6 = vld [vmem:[%s1956_s13 + $0x20] sm:$0xff]  ;;  %v1316_v8 = vld [vmem:[%s1956_s13 + $0x28] sm:$0xff]  ;;  %v1317_v9 = vld [vmem:[%s1956_s13 + $0x30] sm:$0xff]  ;;  %vm790_vm4 = vcmask 56320   ;;  %p502_p1 = scmp.lt.s32.totalorder %s1858_s24, 1 }
  0x60   : > { %572 = vmatpush.msra.mxu0 %v548_v1  ;;  %s1321_s22 = sld [smem:[#allocation6 + $0x3]]  ;;  %v1318_v18 = vld [vmem:[%s1956_s13 + $0x38] sm:$0xff]  ;;  %v629_v52 = vld [vmem:[#allocation13] sm:$0x7f]  ;;  %vm1134_vm5 = vcmask 36864  }
  0x61   : > { %s1322_s26 = sld [smem:[#allocation6 + $0x4]]  ;;  %v789_v63 = vld [vmem:[#allocation14] sm:$0x7f]  ;;  %s2246_s24 = smov (!%p502_p1, %s1858_s24), 1 }
  0x62   : > { %s2237_s5 = sld [smem:[#allocation31_spill]] }
  0x63   : > { %v519_v7 = vstv %s518_s1  ;;  %s2238_s8 = sld [smem:[#allocation34_spill]] }
  0x64   : > { %v520_v10 = vmul.f32 %v519_v7, %v507_v2  ;;  %v523_v11 = vstv %s1319_s25  ;;  %v521_v12 = vmul.f32 %v519_v7, %v508_v3  ;;  %s609_s20 = sld [smem:[#allocation7]] }
  0x65   : > { %v524_v13 = vmul.f32 %v1313_v4, %v523_v11  ;;  %v529_v14 = vstv %s1320_s21  ;;  %v525_v15 = vmul.f32 %v1314_v5, %v523_v11  ;;  %s1327_s15 = sld [smem:[#allocation7 + $0x1]] }
  0x66   : > { %v530_v16 = vmul.f32 %v1315_v6, %v529_v14  ;;  %v535_v17 = vstv %s1321_s22  ;;  %v531_v19 = vmul.f32 %v1316_v8, %v529_v14  ;;  %s1328_s13 = sld [smem:[#allocation7 + $0x80]] }
  0x67   : > { %v526_v20 = vadd.f32 %v524_v13, %v520_v10  ;;  %v536_v21 = vmul.f32 %v1317_v9, %v535_v17  ;;  %v527_v22 = vadd.f32 %v525_v15, %v521_v12  ;;  %v537_v25 = vmul.f32 %v1318_v18, %v535_v17  ;;  %s1329_s1 = sld [smem:[#allocation7 + $0x81]] }
  0x68   : > { %v541_v26 = vstv %s1322_s26  ;;  %v546_v35 = vld [vmem:[%s2237_s5] sm:$0xff]  ;;  %v547_v36 = vld [vmem:[%s2237_s5 + $0x8] sm:$0xf]  ;;  %s744_s25 = sld [smem:[#allocation9]] }
  0x69   : > { %v532_v23 = vadd.f32 %v530_v16, %v526_v20  ;;  %v533_v24 = vadd.f32 %v531_v19, %v527_v22  ;;  %v631_v37 = vld [vmem:[%s2238_s8 + $0x8] sm:$0xf]  ;;  %v630_v38 = vld [vmem:[%s2238_s8] sm:$0xff]  ;;  %s1342_s21 = sld [smem:[#allocation9 + $0x80]] }
  0x6a   : > { %1330 = vmatpush.msk.msra.mxu2 %vm639_vm1, %v631_v37  ;;  %v610_v39 = vstv %s609_s20  ;;  %s1340_s22 = sld [smem:[#allocation9 + $0x1]] }
  0x6b   : > { %v538_v27 = vadd.f32 %v536_v21, %v532_v23  ;;  %v539_v29 = vadd.f32 %v537_v25, %v533_v24  ;;  %v614_v41 = vstv %s1327_s15  ;;  %s1343_s26 = sld [smem:[#allocation9 + $0x81]] }
  0x6c   : > { %658 = vmatpush.msra.mxu2 %v630_v38  ;;  %v620_v50 = vstv %s1328_s13  ;;  %s1348_s30 = sld [smem:[#allocation9 + $0x180]] }
  0x6d   : > { %v542_v28 = vadd.f32 %v541_v26, %v538_v27  ;;  %v543_v31 = vadd.f32 %v541_v26, %v539_v29  ;;  %v624_v54 = vstv %s1329_s1  ;;  %s1349_s17 = sld [smem:[#allocation9 + $0x181]] }
  0x6e   : > { %s1344_s27 = sld [smem:[#allocation9 + $0x82]]  ;;  %v745_v0 = vstv %s744_s25 }
  0x6f   : > { %v544_v30 = vmax.f32 %v542_v28, 0.0  ;;  %v545_v32 = vmax.f32 %v543_v31, 0.0  ;;  %s1341_s29 = sld [smem:[#allocation9 + $0x2]]  ;;  %v756_v1 = vstv %s1342_s21 }
  0x70   : > { %v748_v2 = vstv %s1340_s22  ;;  %s1350_s23 = sld [smem:[#allocation9 + $0x182]] }
  0x71   : > { %1323 = vmatmul.msk.f32.vlgmr.msra.gmra.mxu0 %vm550_vm0, %v544_v30  ;;  %v759_v3 = vstv %s1343_s26  ;;  %s1346_s12 = sld [smem:[#allocation9 + $0x101]] }
  0x72   : > { %v778_v10 = vstv %s1348_s30  ;;  %s1345_s14 = sld [smem:[#allocation9 + $0x100]] }
  0x73   : > { %v781_v5 = vstv %s1349_s17  ;;  %s1347_s16 = sld [smem:[#allocation9 + $0x102]] }
  0x74   : > { %v763_v11 = vstv %s1344_s27  ;;  %s2239_s9 = sld [smem:[#allocation35_spill]] }
  0x75   : > { %v752_v12 = vstv %s1341_s29  ;;  %s2033_s13 = sld [smem:[#allocation10]] }
  0x76   : > { %v785_v22 = vstv %s1350_s23  ;;  %s2035_s1 = sld [smem:[#allocation10 + $0x80]] }
  0x77   : > { %v770_v25 = vstv %s1346_s12  ;;  %s2037_s25 = sld [smem:[#allocation10 + $0x100]] }
  0x78   : > { %v767_v26 = vstv %s1345_s14  ;;  %s2039_s21 = sld [smem:[#allocation10 + $0x180]] }
  0x79   : > { %1324 = vmatmul.msk.f32.gmra.mxu0 %vm550_vm0, %v545_v32  ;;  %s2041_s22 = sld [smem:[#allocation10 + $0x200]] }
  0x7a   : > { %v788_v29 = vld [vmem:[%s2239_s9] sm:$0x1f]  ;;  %s2043_s26 = sld [smem:[#allocation10 + $0x280]] }
  0x7b   : > { %s2045_s30 = sld [smem:[#allocation10 + $0x300]] }
  0x7c   : > { %s2047_s17 = sld [smem:[#allocation10 + $0x380]] }
  0x7d   : > { %s2049_s27 = sld [smem:[#allocation10 + $0x1]] }
  0x7e   : > { %s2051_s29 = sld [smem:[#allocation10 + $0x81]] }
  0x7f   : > { %s2053_s23 = sld [smem:[#allocation10 + $0x101]] }
  0x80   : > { %s2055_s12 = sld [smem:[#allocation10 + $0x181]] }
  0x81   : > { %s2057_s14 = sld [smem:[#allocation10 + $0x201]] }
  0x82   : > { %s2061_s20 = sld [smem:[#allocation10 + $0x301]] }
  0x83   : > { %s2063_s15 = sld [smem:[#allocation10 + $0x381]] }
  0x84   : > { %s2065_s0 = sld [smem:[#allocation10 + $0x2]] }
  0x85   : > { %s2067_s3 = sld [smem:[#allocation10 + $0x82]] }
  0x86   : > { %s2069_s4 = sld [smem:[#allocation10 + $0x102]] }
  0x87   : > { %s2071_s5 = sld [smem:[#allocation10 + $0x182]] }
  0x88   : > { %s2073_s6 = sld [smem:[#allocation10 + $0x202]] }
  0x89   : > { %s2075_s7 = sld [smem:[#allocation10 + $0x282]] }
  0x8a   : > { %s2077_s8 = sld [smem:[#allocation10 + $0x302]] }
  0x8b   : > { %s2079_s9 = sld [smem:[#allocation10 + $0x382]] }
  0x8c   : > { %s2081_s10 = sld [smem:[#allocation10 + $0x3]] }
  0x8d   : > { %s2083_s2 = sld [smem:[#allocation10 + $0x4]] }
  0x8e   : > { %s2085_s19 = sld [smem:[#allocation10 + $0x83]] }
  0x8f   : > { %s2087_s18 = sld [smem:[#allocation10 + $0x84]] }
  0x90   : > { %s2093_s28 = sld [smem:[#allocation10 + $0x103]] }
  0x91   : > { %s2099_s11 = sld [smem:[#allocation10 + $0x104]] }
  0xee   : > { %v574_v33 = vpop.f32.mrf.mxu0 }
  0xf6   : > { %v577_v34 = vpop.f32.mrf.mxu0 }
  0xf7   : > { %600 = vmatpush.msra.mxu1 %v577_v34 }
  0xf9   : > { %601 = vmatpush.msra.mxu1 %v574_v33  ;;  %v774_v33 = vstv %s1347_s16  ;;  %s2059_s16 = sld [smem:[#allocation10 + $0x281]] }
  0xfa   : > { %1325 = vmatmul.msk.f32.vlgmr.msra.gmra.mxu1 %vm550_vm0, %v546_v35 }
  0xfb   : > { %1351 = vmatpush.msk.msrb.mxu1 %vm794_vm3, %v789_v63 }
 0x102   : > { %1326 = vmatmul.msk.f32.gmra.mxu1 %vm550_vm0, %v547_v36 }
 0x177   : > { %v603_v40 = vpop.f32.mrf.mxu1 }
 0x178   : > { %v611_v42 = vmul.f32 %v610_v39, %v603_v40  ;;  %v621_v53 = vmul.f32 %v620_v50, %v603_v40  ;;  %v1002_v40 = vstv %s2035_s1  ;;  %s2111_s1 = sld [smem:[#allocation10 + $0x184]] }
 0x17a   : > { %v615_v43 = vadd.f32 %v614_v41, %v611_v42  ;;  %v625_v55 = vadd.f32 %v624_v54, %v621_v53  ;;  %v1040_v42 = vstv %s2039_s21  ;;  %v1078_v53 = vstv %s2043_s26  ;;  %s2115_s21 = sld [smem:[#allocation10 + $0x283]] }
 0x17b   : > { %s2127_s26 = sld [smem:[#allocation10 + $0x204]] }
 0x17c   : > { %v617_v44 = vmax.f32 %v615_v43, 0.0  ;;  %v627_v56 = vmax.f32 %v625_v55, 0.0  ;;  %v1116_v55 = vstv %s2047_s17  ;;  %s2131_s17 = sld [smem:[#allocation10 + $0x284]] }
 0x17e   : > { %1331 = vmatmul.msk.f32.vlgmr.msra.gmra.mxu2 %vm632_vm2, %v617_v44  ;;  %v986_v44 = vstv %s2049_s27  ;;  %s2133_s27 = sld [smem:[#allocation10 + $0x304]] }
 0x17f   : > { %v606_v45 = vpop.f32.mrf.mxu1 }
 0x180   : > { %v612_v46 = vmul.f32 %v610_v39, %v606_v45  ;;  %v622_v57 = vmul.f32 %v620_v50, %v606_v45  ;;  %v983_v39 = vstv %s2033_s13  ;;  %v1005_v45 = vstv %s2051_s29  ;;  %s2105_s13 = sld [smem:[#allocation10 + $0x183]] }
 0x181   : > { %v1100_v50 = vstv %s2061_s20  ;;  %s2135_s29 = sld [smem:[#allocation10 + $0x384]] }
 0x182   : > { %v616_v47 = vadd.f32 %v614_v41, %v612_v46  ;;  %v626_v58 = vadd.f32 %v624_v54, %v622_v57  ;;  %v1021_v41 = vstv %s2037_s25  ;;  %v1024_v46 = vstv %s2053_s23  ;;  %s2113_s25 = sld [smem:[#allocation10 + $0x203]] }
 0x183   : > { %v1097_v54 = vstv %s2045_s30  ;;  %s2129_s30 = sld [smem:[#allocation10 + $0x383]] }
 0x184   : > { %v618_v48 = vmax.f32 %v616_v47, 0.0  ;;  %v628_v59 = vmax.f32 %v626_v58, 0.0  ;;  %v1043_v47 = vstv %s2055_s12 }
 0x186   : > { %1332 = vmatmul.msk.f32.gmra.mxu2 %vm632_vm2, %v618_v48  ;;  %v1062_v48 = vstv %s2057_s14 }
 0x201   : > { %v660_v49 = vpop.f32.mrf.mxu2 }
 0x209   : > { %v663_v51 = vpop.f32.mrf.mxu2 }
 0x20a   : > { %1333 = vmatpush.msk.msra.mxu3 %vm639_vm1, %v663_v51  ;;  %v1119_v51 = vstv %s2063_s15 }
 0x20c   : > { %687 = vmatpush.msra.mxu3 %v660_v49  ;;  %v1081_v49 = vstv %s2059_s16 }
 0x20d   : > { %1334 = vmatmul.msk.f32.vlgmr.msra.gmra.mxu3 %vm632_vm2, %v629_v52 }
 0x20e   : > { %1335 = vmatpush.msk.msrb.mxu3 %vm639_vm1, %v631_v37 }
 0x210   : > { %713 = vmatpush.msrb.mxu3 %v630_v38 }
 0x215   : > { %1336 = vmatmul.msk.f32.vlgmr.msrb.gmra.mxu3 %vm632_vm2, %v627_v56 }
 0x21d   : > { %1337 = vmatmul.msk.f32.gmra.mxu3 %vm632_vm2, %v628_v59 }
 0x290   : > { %v689_v60 = vpop.f32.mrf.mxu3 }
 0x291   : > { %v746_v6 = vmul.f32 %v745_v0, %v689_v60  ;;  %v757_v7 = vmul.f32 %v756_v1, %v689_v60  ;;  %v779_v16 = vmul.f32 %v778_v10, %v689_v60  ;;  %v768_v28 = vmul.f32 %v767_v26, %v689_v60 }
 0x292   : > { %v1070_v26 = vstv %s2113_s25 }
 0x298   : > { %v715_v61 = vpop.f32.mrf.mxu3 }
 0x2a0   : > { %v718_v62 = vpop.f32.mrf.mxu3 }
 0x2a1   : > { %1338 = vmatpush.msk.msrb.mxu0 %vm639_vm1, %v718_v62 }
 0x2a3   : > { %739 = vmatpush.msrb.mxu0 %v715_v61 }
 0x2a4   : > { %1339 = vmatmul.msk.f32.vlgmr.msrb.gmra.mxu0 %vm632_vm2, %v629_v52  ;;  %v1059_v52 = vstv %s2041_s22  ;;  %s2121_s22 = sld [smem:[#allocation10 + $0x303]] }
 0x2a5   : > { %1355 = vmatpush.msk.msra.mxu0 %vm794_vm3, %v789_v63 }
 0x2a7   : > { %1363 = vmatpush.msk.msrb.mxu0 %vm794_vm3, %v789_v63 }
 0x321   : > { %v741_v4 = vpop.f32.mrf.mxu0 }
 0x322   : > { %v749_v8 = vmul.f32 %v748_v2, %v741_v4  ;;  %v760_v9 = vmul.f32 %v759_v3, %v741_v4  ;;  %v782_v15 = vmul.f32 %v781_v5, %v741_v4  ;;  %v771_v27 = vmul.f32 %v770_v25, %v741_v4 }
 0x323   : > { %v1066_v25 = vstv %s2073_s6 }
 0x324   : > { %v750_v13 = vadd.f32 %v749_v8, %v746_v6  ;;  %v761_v14 = vadd.f32 %v760_v9, %v757_v7  ;;  %v783_v20 = vadd.f32 %v782_v15, %v779_v16  ;;  %v772_v30 = vadd.f32 %v771_v27, %v768_v28 }
 0x325   : > { %v990_v16 = vstv %s2065_s0  ;;  %v1089_v27 = vstv %s2115_s21  ;;  %v1108_v28 = vstv %s2121_s22  ;;  %s1416_s0 = sshll.u32 %s2246_s24, 6 }
 0x326   : > { %v764_v17 = vadd.f32 %v763_v11, %v761_v14  ;;  %v753_v18 = vadd.f32 %v752_v12, %v750_v13  ;;  %v786_v23 = vadd.f32 %v785_v22, %v783_v20  ;;  %v775_v34 = vadd.f32 %v774_v33, %v772_v30 }
 0x327   : > { %v994_v20 = vstv %s2081_s10  ;;  %v1013_v22 = vstv %s2085_s19  ;;  %v1104_v30 = vstv %s2077_s8 }
 0x328   : > { %v765_v19 = vmax.f32 %v764_v17, 0.0  ;;  %v754_v21 = vmax.f32 %v753_v18, 0.0  ;;  %v787_v24 = vmax.f32 %v786_v23, 0.0  ;;  %v776_v35 = vmax.f32 %v775_v34, 0.0 }
 0x329   : > { %v1009_v17 = vstv %s2067_s3  ;;  %v1028_v18 = vstv %s2069_s4  ;;  %v1032_v23 = vstv %s2093_s28 }
 0x32a   : > { %1352 = vmatmul.msk.f32.vlgmr.msrb.gmra.mxu1 %vm790_vm4, %v754_v21  ;;  %1356 = vmatmul.msk.f32.vlgmr.msra.gmra.mxu0 %vm790_vm4, %v765_v19  ;;  %v1047_v21 = vstv %s2071_s5  ;;  %s2240_s5 = sld [smem:[#allocation37_spill]] }
 0x330   : > { %s506_s6 = scalar_lea.vmem %s2240_s5, %s1416_s0 }
 0x332   : > { %1364 = vmatmul.msk.f32.vlgmr.msrb.gmra.mxu0 %vm790_vm4, %v787_v24  ;;  %v1051_v24 = vstv %s2105_s13 }
 0x3a7   : > { %v815_v31 = vpop.f32.mrf.mxu1  ;;  %v864_v32 = vpop.f32.mrf.mxu0 }
 0x3a8   : > { %1353 = vmatpush.msk.msrb.mxu2 %vm794_vm3, %v815_v31  ;;  %1357 = vmatpush.msk.msra.mxu1 %vm794_vm3, %v864_v32  ;;  %v1123_v31 = vstv %s2079_s9 }
 0x3a9   : > { %1354 = vmatmul.msk.f32.vlgmr.msrb.gmra.mxu2 %vm790_vm4, %v788_v29  ;;  %1358 = vmatmul.msk.f32.vlgmr.msra.gmra.mxu1 %vm790_vm4, %v788_v29 }
 0x3aa   : > { %1359 = vmatpush.msk.msra.mxu2 %vm794_vm3, %v789_v63 }
 0x3af   : > { %v956_v36 = vpop.f32.mrf.mxu0 }
 0x3b0   : > { %1365 = vmatpush.msk.msrb.mxu1 %vm794_vm3, %v956_v36  ;;  %v1127_v36 = vstv %s2129_s30 }
 0x3b1   : > { %1360 = vmatmul.msk.f32.vlgmr.msra.gmra.mxu2 %vm790_vm4, %v776_v35  ;;  %1366 = vmatmul.msk.f32.vlgmr.msrb.gmra.mxu1 %vm790_vm4, %v788_v29 }
 0x426   : > { %v887_v43 = vpop.f32.mrf.mxu1 }
 0x427   : > { %v987_v56 = vmul.f32 %v986_v44, %v887_v43  ;;  %v1006_v57 = vmul.f32 %v1005_v45, %v887_v43  ;;  %v1025_v58 = vmul.f32 %v1024_v46, %v887_v43  ;;  %v1044_v59 = vmul.f32 %v1043_v47, %v887_v43 }
 0x428   : > { %v1063_v60 = vmul.f32 %v1062_v48, %v887_v43  ;;  %v1082_v61 = vmul.f32 %v1081_v49, %v887_v43  ;;  %v1101_v62 = vmul.f32 %v1100_v50, %v887_v43  ;;  %v1120_v63 = vmul.f32 %v1119_v51, %v887_v43 }
 0x429   : > { %v1055_v43 = vstv %s2111_s1  ;;  %v1074_v44 = vstv %s2127_s26  ;;  %v1093_v46 = vstv %s2131_s17  ;;  %v1112_v47 = vstv %s2133_s27 }
 0x42a   : > { %v1131_v49 = vstv %s2135_s29 }
 0x42c   : > { %v2029_v37 = vpop.f32.mrf.mxu2 }
 0x42d   : > { %v984_v0 = vmul.f32 %v983_v39, %v2029_v37  ;;  %v1003_v1 = vmul.f32 %v1002_v40, %v2029_v37  ;;  %v1022_v2 = vmul.f32 %v1021_v41, %v2029_v37  ;;  %v1041_v3 = vmul.f32 %v1040_v42, %v2029_v37 }
 0x42e   : > { %v1060_v4 = vmul.f32 %v1059_v52, %v2029_v37  ;;  %v1079_v5 = vmul.f32 %v1078_v53, %v2029_v37  ;;  %v1098_v6 = vmul.f32 %v1097_v54, %v2029_v37  ;;  %v1117_v7 = vmul.f32 %v1116_v55, %v2029_v37  ;;  %v979_v19 = vpop.f32.mrf.mxu1 }
 0x42f   : > { %v988_v8 = vadd.f32 %v987_v56, %v984_v0  ;;  %v1007_v9 = vadd.f32 %v1006_v57, %v1003_v1  ;;  %v1026_v10 = vadd.f32 %v1025_v58, %v1022_v2  ;;  %v1045_v11 = vadd.f32 %v1044_v59, %v1041_v3 }
 0x430   : > { %v1064_v12 = vadd.f32 %v1063_v60, %v1060_v4  ;;  %v1083_v13 = vadd.f32 %v1082_v61, %v1079_v5  ;;  %v1102_v14 = vadd.f32 %v1101_v62, %v1098_v6  ;;  %v1121_v15 = vadd.f32 %v1120_v63, %v1117_v7 }
 0x431   : > { %v995_v32 = vmul.f32 %v994_v20, %v979_v19  ;;  %v1014_v33 = vmul.f32 %v1013_v22, %v979_v19  ;;  %v1033_v34 = vmul.f32 %v1032_v23, %v979_v19  ;;  %v1052_v35 = vmul.f32 %v1051_v24, %v979_v19 }
 0x432   : > { %v998_v37 = vstv %s2083_s2  ;;  %v1090_v39 = vmul.f32 %v1089_v27, %v979_v19  ;;  %v1109_v40 = vmul.f32 %v1108_v28, %v979_v19  ;;  %v1017_v41 = vstv %s2087_s18 }
 0x433   : > { %v1036_v42 = vstv %s2099_s11  ;;  %v1128_v48 = vmul.f32 %v1127_v36, %v979_v19 }
 0x434   : > { %v910_v38 = vpop.f32.mrf.mxu2 }
 0x435   : > { %1361 = vmatpush.msk.msra.mxu3 %vm794_vm3, %v910_v38  ;;  %v1071_v38 = vmul.f32 %v1070_v26, %v979_v19 }
 0x436   : > { %1362 = vmatmul.msk.f32.vlgmr.msra.gmra.mxu3 %vm790_vm4, %v788_v29  ;;  %v1085_v29 = vstv %s2075_s7 }
 0x4b9   : > { %v933_v45 = vpop.f32.mrf.mxu3 }
 0x4ba   : > { %v991_v50 = vmul.f32 %v990_v16, %v933_v45  ;;  %v1010_v51 = vmul.f32 %v1009_v17, %v933_v45  ;;  %v1029_v52 = vmul.f32 %v1028_v18, %v933_v45  ;;  %v1048_v53 = vmul.f32 %v1047_v21, %v933_v45 }
 0x4bb   : > { %v1067_v54 = vmul.f32 %v1066_v25, %v933_v45  ;;  %v1086_v55 = vmul.f32 %v1085_v29, %v933_v45  ;;  %v1105_v56 = vmul.f32 %v1104_v30, %v933_v45  ;;  %v1124_v57 = vmul.f32 %v1123_v31, %v933_v45 }
 0x4bc   : > { %v992_v58 = vadd.f32 %v991_v50, %v988_v8  ;;  %v1011_v59 = vadd.f32 %v1010_v51, %v1007_v9  ;;  %v1030_v60 = vadd.f32 %v1029_v52, %v1026_v10  ;;  %v1049_v61 = vadd.f32 %v1048_v53, %v1045_v11 }
 0x4bd   : > { %v1068_v62 = vadd.f32 %v1067_v54, %v1064_v12  ;;  %v1087_v63 = vadd.f32 %v1086_v55, %v1083_v13  ;;  %v1106_v0 = vadd.f32 %v1105_v56, %v1102_v14  ;;  %v1125_v1 = vadd.f32 %v1124_v57, %v1121_v15 }
 0x4be   : > { %v996_v2 = vadd.f32 %v995_v32, %v992_v58  ;;  %v1015_v3 = vadd.f32 %v1014_v33, %v1011_v59  ;;  %v1034_v4 = vadd.f32 %v1033_v34, %v1030_v60  ;;  %v1053_v5 = vadd.f32 %v1052_v35, %v1049_v61 }
 0x4bf   : > { %v1072_v6 = vadd.f32 %v1071_v38, %v1068_v62  ;;  %v1091_v7 = vadd.f32 %v1090_v39, %v1087_v63  ;;  %v1110_v16 = vadd.f32 %v1109_v40, %v1106_v0  ;;  %v1129_v17 = vadd.f32 %v1128_v48, %v1125_v1 }
 0x4c0   : > { %v999_v18 = vadd.f32 %v998_v37, %v996_v2  ;;  %v1018_v19 = vadd.f32 %v1017_v41, %v1015_v3  ;;  %v1037_v20 = vadd.f32 %v1036_v42, %v1034_v4  ;;  %v1056_v8 = vadd.f32 %v1055_v43, %v1053_v5 }
 0x4c1   : > { %v1075_v9 = vadd.f32 %v1074_v44, %v1072_v6  ;;  %v1094_v10 = vadd.f32 %v1093_v46, %v1091_v7  ;;  %v1113_v14 = vadd.f32 %v1112_v47, %v1110_v16  ;;  %v1132_v21 = vadd.f32 %v1131_v49, %v1129_v17 }
 0x4c2   : > { %v1000_v11 = vmax.f32 %v999_v18, 0.0  ;;  %v1019_v12 = vmax.f32 %v1018_v19, 0.0  ;;  %v1038_v13 = vmax.f32 %v1037_v20, 0.0  ;;  %v1057_v15 = vmax.f32 %v1056_v8, 0.0 }
 0x4c3   : > { %v1076_v22 = vmax.f32 %v1075_v9, 0.0  ;;  %v1095_v23 = vmax.f32 %v1094_v10, 0.0  ;;  %v1114_v24 = vmax.f32 %v1113_v14, 0.0  ;;  %v1133_v25 = vmax.f32 %v1132_v21, 0.0 }
 0x4c4   : > { %1135 = vst.msk [vmem:[%s506_s6] sm:$0x1f] %vm1134_vm5, %v1000_v11 }
 0x4c5   : > { %1406 = vst.msk [vmem:[%s506_s6 + $0x8] sm:$0x1f] %vm1134_vm5, %v1019_v12 }
 0x4c6   : > { %1407 = vst.msk [vmem:[%s506_s6 + $0x10] sm:$0x1f] %vm1134_vm5, %v1038_v13 }
 0x4c7   : > { %1408 = vst.msk [vmem:[%s506_s6 + $0x18] sm:$0x1f] %vm1134_vm5, %v1057_v15 }
 0x4c8   : > { %1409 = vst.msk [vmem:[%s506_s6 + $0x20] sm:$0x1f] %vm1134_vm5, %v1076_v22 }
 0x4c9   : > { %1410 = vst.msk [vmem:[%s506_s6 + $0x28] sm:$0x1f] %vm1134_vm5, %v1095_v23 }
 0x4ca   : > { %1411 = vst.msk [vmem:[%s506_s6 + $0x30] sm:$0x1f] %vm1134_vm5, %v1114_v24 }
 0x4cb   : > { %1412 = vst.msk [vmem:[%s506_s6 + $0x38] sm:$0x1f] %vm1134_vm5, %v1133_v25 }
 0x4cc PF: > { %s2241_s20 = sld [smem:[#allocation24_spill]] }
 0x4cd   : > { %s2242_s17 = sld [smem:[#allocation22_spill]] }
 0x4ce   : > { %s2243_s18 = sld [smem:[#allocation23_spill]] }
 0x4cf   : > { %s2244_s19 = sld [smem:[#allocation25_spill]] }
 0x4d2   : > { %p26_p3 = scmp.ge.s32.totalorder %s2241_s20, 4  }
 0x4d4   :  { %28 = sbr.rel (!%p26_p3) target bundleno = 21 (0x15), region = 144 }
 0x4d9   :  { %1171 = vsyncpa [#allocation3], 1 }
 0x4da   :  { %1173 = vsyncpa [#allocation3 + $0x1], 1 }
 0x4db   :  { %1174 = vsyncpa [#allocation12], 1 }
 0x4dc   :  { %1175 = vsyncpa [#allocation15], 1 }
 0x4dd   :  { %1176 = vsyncpa [#allocation4], 1 }
 0x4de   :  { %1178 = vsyncpa [#allocation4 + $0x1], 1 }
 0x4df   :  { %1179 = vsyncpa [#allocation8], 1 }
 0x4e0   :  { %1180 = vsyncpa [#allocation5], 1 }
 0x4e1   :  { %1182 = vsyncpa [#allocation5 + $0x1], 1 }

</bundles_post_ra>
